<compile_context>
chip_gen: v7x
topology: tpu7x:2x2x1
jax: 0.10.0
libtpu: 0.0.40
codegen_flags: <defaults>
</compile_context>

<pallas_src>
import functools

import jax
import jax.numpy as jnp
import numpy as np
from jax import lax
from jax.experimental import pallas as pl
from jax.experimental.pallas import tpu as pltpu


def _encoder_layer_kernel(
    x_ref,
    wqkv_ref, bqkv_ref,
    wo_ref, bo_ref,
    w1_ref, b1_ref,
    w2_ref, b2_ref,
    o_ref,
    *, batch: int, scale: float, eps: float,
):
    m, d = x_ref.shape                     # m = block_s * batch (flattened rows)
    ts = m // batch

    x2 = x_ref[...].astype(jnp.float32)    # residual / LayerNorm path stays f32
    x_bf = x2.astype(jnp.bfloat16)         # cast ONCE for the MXU

    def layernorm(t):
        # Parameter-free LayerNorm, biased variance, eps inside the sqrt.
        mean = jnp.mean(t, axis=-1, keepdims=True)
        var = jnp.mean(jnp.square(t - mean), axis=-1, keepdims=True)
        return (t - mean) * lax.rsqrt(var + eps)     # rsqrt -> EUP slot

    # --- Fused Q/K/V projection: one (m, d) x (d, 3d) MXU matmul. ---
    qkv = jnp.dot(x_bf, wqkv_ref[...],
                  preferred_element_type=jnp.float32) + bqkv_ref[...]
    q = qkv[:, :d]
    k = qkv[:, d:2 * d]
    v = qkv[:, 2 * d:]

    # 3-D views only where the batch-axis attention needs them.
    q3 = q.reshape(ts, batch, d)
    k3 = k.reshape(ts, batch, d)
    v3 = v.reshape(ts, batch, d)

    # --- Batch-axis attention exactly as in the reference (torch.bmm over the
    # seq dim, no head split).  Computed on the VPU/XLU (broadcast-multiply-
    # reduce): at B x B these matmuls would waste the MXU. ---
    scores = jnp.sum(q3[:, :, None, :] * k3[:, None, :, :], axis=-1) * scale  # (ts,B,B)
    scores = scores - jnp.max(scores, axis=-1, keepdims=True)
    p = jnp.exp(scores)
    attn = p * pl.reciprocal(jnp.sum(p, axis=-1, keepdims=True))   # exact, EUP
    ctx = jnp.sum(attn[..., None] * v3[:, None, :, :], axis=2)     # (ts,B,D)
    ctx2 = ctx.reshape(m, d)

    # --- Output projection, residual + LayerNorm 1 ---
    attn_out = jnp.dot(ctx2.astype(jnp.bfloat16), wo_ref[...],
                       preferred_element_type=jnp.float32) + bo_ref[...]
    norm_attn = layernorm(x2 + attn_out)

    # --- Feed forward: Linear -> ReLU -> Linear (hidden kept in bf16) ---
    h = jnp.maximum(
        jnp.dot(norm_attn.astype(jnp.bfloat16), w1_ref[...],
                preferred_element_type=jnp.float32) + b1_ref[...],
        0.0,
    ).astype(jnp.bfloat16)
    ff = jnp.dot(h, w2_ref[...],
                 preferred_element_type=jnp.float32) + b2_ref[...]

    # --- Final residual uses the ORIGINAL inputs + parameter-free LayerNorm ---
    out = layernorm(x2 + ff)
    o_ref[...] = out.astype(o_ref.dtype)


def prepare_encoder_params(params):
    """One-time parameter prep (call at load time, NOT per forward call):
    PyTorch (out, in) weights -> (in, out) bf16; Q/K/V fused; biases f32 rows."""
    def w_t(name):
        return jnp.asarray(params[name]).T.astype(jnp.bfloat16)

    def b_f(name):
        return jnp.asarray(params[name], jnp.float32).reshape(1, -1)

    return {
        "wqkv": jnp.concatenate([w_t("wq"), w_t("wk"), w_t("wv")], axis=1),
        "bqkv": jnp.concatenate([b_f("bq"), b_f("bk"), b_f("bv")], axis=1),
        "wo": w_t("wo"), "bo": b_f("bo"),
        "w1": w_t("w1"), "b1": b_f("b1"),
        "w2": w_t("w2"), "b2": b_f("b2"),
    }


def encoder_layer(x, prepared, *, n_head: int, eps: float = 1e-8, block_s=None):
    """x: (S, B, D) float32. prepared: output of prepare_encoder_params."""
    S, B, D = x.shape
    dim_linear = prepared["w1"].shape[1]
    head_dim = D // n_head
    scale = 1.0 / float(np.sqrt(head_dim))

    # Pick a seq block so the flattened M dimension reaches ~256 rows (fills the
    # 256-wide MXU on v6e/v7x; harmless on v5e).  Collapses to one grid step at
    # toy sizes; rows per block must stay a multiple of 8 (sublane tiling).
    if block_s is None:
        target_rows = min(256, S * B)
        block_s = S
        for cand in range(1, S + 1):
            if S % cand == 0 and cand * B >= target_rows and (cand * B) % 8 == 0:
                block_s = cand
                break
    assert S % block_s == 0
    m_blk = block_s * B

    # Flatten (S, B, D) -> (S*B, D) wrapper-side: the kernel never reshapes its
    # residual/LayerNorm path, and the layout is lane-dense when D % 128 == 0.
    x2 = x.reshape(S * B, D)

    # Grid-invariant (resident) operands: constant index_map.
    # TODO(synk): at production sizes, single-buffer the resident weights
    # (pipeline_mode=pl.Buffered(1)) and tile the FF over dim_linear so
    # double-buffered weights + the hidden slab fit v7x's 64 MiB VMEM.
    resident = lambda shape: pl.BlockSpec(shape, lambda s: (0, 0))

    kernel = functools.partial(_encoder_layer_kernel,
                               batch=B, scale=scale, eps=eps)

    grid_spec = pltpu.PrefetchScalarGridSpec(
        num_scalar_prefetch=0,
        grid=(S // block_s,),
        in_specs=[
            pl.BlockSpec((m_blk, D), lambda s: (s, 0)),            # x (flattened)
            resident((D, 3 * D)), resident((1, 3 * D)),            # Wqkv, bqkv
            resident((D, D)), resident((1, D)),                    # Wo, bo
            resident((D, dim_linear)), resident((1, dim_linear)),  # W1, b1
            resident((dim_linear, D)), resident((1, D)),           # W2, b2
        ],
        out_specs=pl.BlockSpec((m_blk, D), lambda s: (s, 0)),
    )

    M = S * B
    flops = (2 * M * D * 3 * D) + (2 * M * D * D) \
            + (4 * S * B * B * D) + (4 * M * D * dim_linear)
    transcendentals = S * B * B + 3 * S * B
    bytes_accessed = (
        2 * M * D * 4                                   # x in + out (f32)
        + 2 * (4 * D * D + 2 * D * dim_linear)          # bf16 weights
        + 4 * (5 * D + dim_linear)                      # f32 biases
    )

    out2 = pl.pallas_call(
        kernel,
        grid_spec=grid_spec,
        out_shape=jax.ShapeDtypeStruct((S * B, D), x.dtype),
        compiler_params=pltpu.CompilerParams(
            dimension_semantics=("parallel",),
            vmem_limit_bytes=32 * 1024 * 1024),
        cost_estimate=pl.CostEstimate(
            flops=flops, transcendentals=transcendentals,
            bytes_accessed=bytes_accessed),
    )(
        x2,
        prepared["wqkv"], prepared["bqkv"],
        prepared["wo"], prepared["bo"],
        prepared["w1"], prepared["b1"],
        prepared["w2"], prepared["b2"],
    )
    return out2.reshape(S, B, D)


def _reference(x, params, *, n_head: int, eps: float = 1e-8):
    """Plain-JAX f32 reference mirroring the PyTorch module, for verification."""
    S, B, D = x.shape
    head_dim = D // n_head

    def lin(v, w, b):
        return jnp.einsum("sbd,od->sbo", v, w) + b[0]

    def layernorm(t):
        mean = jnp.mean(t, axis=-1, keepdims=True)
        var = jnp.mean(jnp.square(t - mean), axis=-1, keepdims=True)
        return (t - mean) / jnp.sqrt(var + eps)

    q = lin(x, params["wq"], params["bq"])
    k = lin(x, params["wk"], params["bk"])
    v = lin(x, params["wv"], params["bv"])
    scores = jnp.einsum("sbd,scd->sbc", q, k) / np.sqrt(head_dim)
    attn = jax.nn.softmax(scores, axis=-1)
    ctx = jnp.einsum("sbc,scd->sbd", attn, v)
    attn_out = lin(ctx, params["wo"], params["bo"])
    norm_attn = layernorm(x + attn_out)
    h = jnp.maximum(lin(norm_attn, params["w1"], params["b1"]), 0.0)
    ff = lin(h, params["w2"], params["b2"])
    return layernorm(x + ff)


if __name__ == "__main__":
    S, B, D = 8, 4, 32           # seq_len, batch, d_model
    n_head = 4
    dim_linear = 256

    key = jax.random.PRNGKey(0)
    keys = jax.random.split(key, 13)

    def w(k, shape, fan_in):
        return (jax.random.normal(k, shape, jnp.float32) / np.sqrt(fan_in)).astype(
            jnp.float32
        )

    params = {
        "wq": w(keys[0], (D, D), D), "bq": w(keys[1], (1, D), D),
        "wk": w(keys[2], (D, D), D), "bk": w(keys[3], (1, D), D),
        "wv": w(keys[4], (D, D), D), "bv": w(keys[5], (1, D), D),
        "wo": w(keys[6], (D, D), D), "bo": w(keys[7], (1, D), D),
        "w1": w(keys[8], (dim_linear, D), D), "b1": w(keys[9], (1, dim_linear), D),
        "w2": w(keys[10], (D, dim_linear), dim_linear),
        "b2": w(keys[11], (1, D), dim_linear),
    }

    x = jax.random.normal(keys[12], (S, B, D), jnp.float32)

    prepared = prepare_encoder_params(params)   # one-time parameter prep

    out = encoder_layer(x, prepared, n_head=n_head)
    out = jax.block_until_ready(out)

    ref = _reference(x, params, n_head=n_head)
    # bf16 matmul inputs (f32 accumulation) -> loosened tolerance vs f32 reference.
    np.testing.assert_allclose(np.asarray(out), np.asarray(ref), rtol=5e-2, atol=5e-2)

    print("KERNEL_OK")
</pallas_src>

<mosaic_0001>
module attributes {stable_mosaic.version = 11 : i64} {
  func.func @_encoder_layer_kernel(%arg0: i32, %arg1: memref<32x32xf32, #tpu.memory_space<vmem>>, %arg2: memref<32x96xbf16, #tpu.memory_space<vmem>>, %arg3: memref<1x96xf32, #tpu.memory_space<vmem>>, %arg4: memref<32x32xbf16, #tpu.memory_space<vmem>>, %arg5: memref<1x32xf32, #tpu.memory_space<vmem>>, %arg6: memref<32x256xbf16, #tpu.memory_space<vmem>>, %arg7: memref<1x256xf32, #tpu.memory_space<vmem>>, %arg8: memref<256x32xbf16, #tpu.memory_space<vmem>>, %arg9: memref<1x32xf32, #tpu.memory_space<vmem>>, %arg10: memref<32x32xf32, #tpu.memory_space<vmem>>) attributes {dimension_semantics = [#tpu.dimension_semantics<parallel>], iteration_bounds = array<i64: 1>, scalar_prefetch = 0 : i64, scratch_operands = 0 : i64, tpu.core_type = #tpu.core_type<tc>, window_params = [{transform_indices = @transform_0, window_bounds = array<i64: 32, 32>}, {pipeline_mode = #tpu.pipeline_mode<synchronous>, transform_indices = @transform_1, window_bounds = array<i64: 32, 96>}, {pipeline_mode = #tpu.pipeline_mode<synchronous>, transform_indices = @transform_2, window_bounds = array<i64: 1, 96>}, {pipeline_mode = #tpu.pipeline_mode<synchronous>, transform_indices = @transform_3, window_bounds = array<i64: 32, 32>}, {pipeline_mode = #tpu.pipeline_mode<synchronous>, transform_indices = @transform_4, window_bounds = array<i64: 1, 32>}, {pipeline_mode = #tpu.pipeline_mode<synchronous>, transform_indices = @transform_5, window_bounds = array<i64: 32, 256>}, {pipeline_mode = #tpu.pipeline_mode<synchronous>, transform_indices = @transform_6, window_bounds = array<i64: 1, 256>}, {pipeline_mode = #tpu.pipeline_mode<synchronous>, transform_indices = @transform_7, window_bounds = array<i64: 256, 32>}, {pipeline_mode = #tpu.pipeline_mode<synchronous>, transform_indices = @transform_8, window_bounds = array<i64: 1, 32>}, {transform_indices = @transform_9, window_bounds = array<i64: 32, 32>}]} {
    %c0 = arith.constant 0 : index
    %c0_0 = arith.constant 0 : index
    %0 = vector.load %arg1[%c0, %c0_0] : memref<32x32xf32, #tpu.memory_space<vmem>>, vector<32x32xf32>
    %1 = arith.truncf %0 : vector<32x32xf32> to vector<32x32xbf16>
    %c0_1 = arith.constant 0 : index
    %c0_2 = arith.constant 0 : index
    %2 = vector.load %arg2[%c0_1, %c0_2] : memref<32x96xbf16, #tpu.memory_space<vmem>>, vector<32x96xbf16>
    %cst = arith.constant dense<0.000000e+00> : vector<32x96xf32>
    %3 = tpu.matmul %1, %2, %cst {dimension_numbers = #tpu.dot_dimension_numbers<[1], [0], [0], [1], [0, 0, 1, 1], [], []>} : vector<32x32xbf16>, vector<32x96xbf16>, vector<32x96xf32> -> vector<32x96xf32>
    %c0_3 = arith.constant 0 : index
    %c0_4 = arith.constant 0 : index
    %4 = vector.load %arg3[%c0_3, %c0_4] : memref<1x96xf32, #tpu.memory_space<vmem>>, vector<1x96xf32>
    %5 = vector.broadcast %4 : vector<1x96xf32> to vector<32x96xf32>
    %6 = arith.addf %3, %5 : vector<32x96xf32>
    %7 = vector.extract_strided_slice %6 {offsets = [0, 0], sizes = [32, 32], strides = [1, 1]} : vector<32x96xf32> to vector<32x32xf32>
    %8 = vector.extract_strided_slice %6 {offsets = [0, 32], sizes = [32, 32], strides = [1, 1]} : vector<32x96xf32> to vector<32x32xf32>
    %9 = vector.extract_strided_slice %6 {offsets = [0, 64], sizes = [32, 32], strides = [1, 1]} : vector<32x96xf32> to vector<32x32xf32>
    %10 = vector.shape_cast %7 : vector<32x32xf32> to vector<8x4x32xf32>
    %11 = vector.shape_cast %8 : vector<32x32xf32> to vector<8x4x32xf32>
    %12 = vector.shape_cast %9 : vector<32x32xf32> to vector<8x4x32xf32>
    %13 = vector.shape_cast %10 : vector<8x4x32xf32> to vector<8x4x1x32xf32>
    %14 = vector.shape_cast %11 : vector<8x4x32xf32> to vector<8x1x4x32xf32>
    %15 = vector.broadcast %13 : vector<8x4x1x32xf32> to vector<8x4x4x32xf32>
    %16 = vector.broadcast %14 : vector<8x1x4x32xf32> to vector<8x4x4x32xf32>
    %17 = arith.mulf %15, %16 : vector<8x4x4x32xf32>
    %cst_5 = arith.constant dense<0.000000e+00> : vector<8x4x4xf32>
    %18 = vector.multi_reduction <add>, %17, %cst_5 [3] : vector<8x4x4x32xf32> to vector<8x4x4xf32>
    %cst_6 = arith.constant 0.353553385 : f32
    %19 = vector.broadcast %cst_6 : f32 to vector<8x4x4xf32>
    %20 = arith.mulf %18, %19 : vector<8x4x4xf32>
    %cst_7 = arith.constant dense<0xFF800000> : vector<8x4xf32>
    %21 = vector.multi_reduction <maximumf>, %20, %cst_7 [2] : vector<8x4x4xf32> to vector<8x4xf32>
    %22 = vector.shape_cast %21 : vector<8x4xf32> to vector<8x4x1xf32>
    %23 = vector.broadcast %22 : vector<8x4x1xf32> to vector<8x4x4xf32>
    %24 = arith.subf %20, %23 : vector<8x4x4xf32>
    %25 = math.exp %24 : vector<8x4x4xf32>
    %cst_8 = arith.constant dense<0.000000e+00> : vector<8x4xf32>
    %26 = vector.multi_reduction <add>, %25, %cst_8 [2] : vector<8x4x4xf32> to vector<8x4xf32>
    %27 = vector.shape_cast %26 : vector<8x4xf32> to vector<8x4x1xf32>
    %28 = tpu.reciprocal %27 : vector<8x4x1xf32> -> vector<8x4x1xf32>
    %29 = vector.broadcast %28 : vector<8x4x1xf32> to vector<8x4x4xf32>
    %30 = arith.mulf %25, %29 : vector<8x4x4xf32>
    %31 = vector.shape_cast %30 : vector<8x4x4xf32> to vector<8x4x4x1xf32>
    %32 = vector.shape_cast %12 : vector<8x4x32xf32> to vector<8x1x4x32xf32>
    %33 = vector.broadcast %31 : vector<8x4x4x1xf32> to vector<8x4x4x32xf32>
    %34 = vector.broadcast %32 : vector<8x1x4x32xf32> to vector<8x4x4x32xf32>
    %35 = arith.mulf %33, %34 : vector<8x4x4x32xf32>
    %cst_9 = arith.constant dense<0.000000e+00> : vector<8x4x32xf32>
    %36 = vector.multi_reduction <add>, %35, %cst_9 [2] : vector<8x4x4x32xf32> to vector<8x4x32xf32>
    %37 = vector.shape_cast %36 : vector<8x4x32xf32> to vector<32x32xf32>
    %38 = arith.truncf %37 : vector<32x32xf32> to vector<32x32xbf16>
    %c0_10 = arith.constant 0 : index
    %c0_11 = arith.constant 0 : index
    %39 = vector.load %arg4[%c0_10, %c0_11] : memref<32x32xbf16, #tpu.memory_space<vmem>>, vector<32x32xbf16>
    %cst_12 = arith.constant dense<0.000000e+00> : vector<32x32xf32>
    %40 = tpu.matmul %38, %39, %cst_12 {dimension_numbers = #tpu.dot_dimension_numbers<[1], [0], [0], [1], [0, 0, 1, 1], [], []>} : vector<32x32xbf16>, vector<32x32xbf16>, vector<32x32xf32> -> vector<32x32xf32>
    %c0_13 = arith.constant 0 : index
    %c0_14 = arith.constant 0 : index
    %41 = vector.load %arg5[%c0_13, %c0_14] : memref<1x32xf32, #tpu.memory_space<vmem>>, vector<1x32xf32>
    %42 = vector.broadcast %41 : vector<1x32xf32> to vector<32x32xf32>
    %43 = arith.addf %40, %42 : vector<32x32xf32>
    %44 = arith.addf %0, %43 : vector<32x32xf32>
    %cst_15 = arith.constant dense<0.000000e+00> : vector<32xf32>
    %45 = vector.multi_reduction <add>, %44, %cst_15 [1] : vector<32x32xf32> to vector<32xf32>
    %46 = vector.shape_cast %45 : vector<32xf32> to vector<32x1xf32>
    %cst_16 = arith.constant 3.200000e+01 : f32
    %47 = vector.broadcast %cst_16 : f32 to vector<32x1xf32>
    %48 = arith.divf %46, %47 : vector<32x1xf32>
    %49 = vector.broadcast %48 : vector<32x1xf32> to vector<32x32xf32>
    %50 = arith.subf %44, %49 : vector<32x32xf32>
    %51 = arith.mulf %50, %50 : vector<32x32xf32>
    %cst_17 = arith.constant dense<0.000000e+00> : vector<32xf32>
    %52 = vector.multi_reduction <add>, %51, %cst_17 [1] : vector<32x32xf32> to vector<32xf32>
    %53 = vector.shape_cast %52 : vector<32xf32> to vector<32x1xf32>
    %cst_18 = arith.constant 3.200000e+01 : f32
    %54 = vector.broadcast %cst_18 : f32 to vector<32x1xf32>
    %55 = arith.divf %53, %54 : vector<32x1xf32>
    %56 = vector.broadcast %48 : vector<32x1xf32> to vector<32x32xf32>
    %57 = arith.subf %44, %56 : vector<32x32xf32>
    %cst_19 = arith.constant 9.99999993E-9 : f32
    %58 = vector.broadcast %cst_19 : f32 to vector<32x1xf32>
    %59 = arith.addf %55, %58 : vector<32x1xf32>
    %60 = math.rsqrt %59 : vector<32x1xf32>
    %61 = vector.broadcast %60 : vector<32x1xf32> to vector<32x32xf32>
    %62 = arith.mulf %57, %61 : vector<32x32xf32>
    %63 = arith.truncf %62 : vector<32x32xf32> to vector<32x32xbf16>
    %c0_20 = arith.constant 0 : index
    %c0_21 = arith.constant 0 : index
    %64 = vector.load %arg6[%c0_20, %c0_21] : memref<32x256xbf16, #tpu.memory_space<vmem>>, vector<32x256xbf16>
    %cst_22 = arith.constant dense<0.000000e+00> : vector<32x256xf32>
    %65 = tpu.matmul %63, %64, %cst_22 {dimension_numbers = #tpu.dot_dimension_numbers<[1], [0], [0], [1], [0, 0, 1, 1], [], []>} : vector<32x32xbf16>, vector<32x256xbf16>, vector<32x256xf32> -> vector<32x256xf32>
    %c0_23 = arith.constant 0 : index
    %c0_24 = arith.constant 0 : index
    %66 = vector.load %arg7[%c0_23, %c0_24] : memref<1x256xf32, #tpu.memory_space<vmem>>, vector<1x256xf32>
    %67 = vector.broadcast %66 : vector<1x256xf32> to vector<32x256xf32>
    %68 = arith.addf %65, %67 : vector<32x256xf32>
    %cst_25 = arith.constant 0.000000e+00 : f32
    %69 = vector.broadcast %cst_25 : f32 to vector<32x256xf32>
    %70 = arith.maximumf %68, %69 : vector<32x256xf32>
    %71 = arith.truncf %70 : vector<32x256xf32> to vector<32x256xbf16>
    %c0_26 = arith.constant 0 : index
    %c0_27 = arith.constant 0 : index
    %72 = vector.load %arg8[%c0_26, %c0_27] : memref<256x32xbf16, #tpu.memory_space<vmem>>, vector<256x32xbf16>
    %cst_28 = arith.constant dense<0.000000e+00> : vector<32x32xf32>
    %73 = tpu.matmul %71, %72, %cst_28 {dimension_numbers = #tpu.dot_dimension_numbers<[1], [0], [0], [1], [0, 0, 1, 1], [], []>} : vector<32x256xbf16>, vector<256x32xbf16>, vector<32x32xf32> -> vector<32x32xf32>
    %c0_29 = arith.constant 0 : index
    %c0_30 = arith.constant 0 : index
    %74 = vector.load %arg9[%c0_29, %c0_30] : memref<1x32xf32, #tpu.memory_space<vmem>>, vector<1x32xf32>
    %75 = vector.broadcast %74 : vector<1x32xf32> to vector<32x32xf32>
    %76 = arith.addf %73, %75 : vector<32x32xf32>
    %77 = arith.addf %0, %76 : vector<32x32xf32>
    %cst_31 = arith.constant dense<0.000000e+00> : vector<32xf32>
    %78 = vector.multi_reduction <add>, %77, %cst_31 [1] : vector<32x32xf32> to vector<32xf32>
    %79 = vector.shape_cast %78 : vector<32xf32> to vector<32x1xf32>
    %cst_32 = arith.constant 3.200000e+01 : f32
    %80 = vector.broadcast %cst_32 : f32 to vector<32x1xf32>
    %81 = arith.divf %79, %80 : vector<32x1xf32>
    %82 = vector.broadcast %81 : vector<32x1xf32> to vector<32x32xf32>
    %83 = arith.subf %77, %82 : vector<32x32xf32>
    %84 = arith.mulf %83, %83 : vector<32x32xf32>
    %cst_33 = arith.constant dense<0.000000e+00> : vector<32xf32>
    %85 = vector.multi_reduction <add>, %84, %cst_33 [1] : vector<32x32xf32> to vector<32xf32>
    %86 = vector.shape_cast %85 : vector<32xf32> to vector<32x1xf32>
    %cst_34 = arith.constant 3.200000e+01 : f32
    %87 = vector.broadcast %cst_34 : f32 to vector<32x1xf32>
    %88 = arith.divf %86, %87 : vector<32x1xf32>
    %89 = vector.broadcast %81 : vector<32x1xf32> to vector<32x32xf32>
    %90 = arith.subf %77, %89 : vector<32x32xf32>
    %cst_35 = arith.constant 9.99999993E-9 : f32
    %91 = vector.broadcast %cst_35 : f32 to vector<32x1xf32>
    %92 = arith.addf %88, %91 : vector<32x1xf32>
    %93 = math.rsqrt %92 : vector<32x1xf32>
    %94 = vector.broadcast %93 : vector<32x1xf32> to vector<32x32xf32>
    %95 = arith.mulf %90, %94 : vector<32x32xf32>
    %c0_36 = arith.constant 0 : index
    %c0_37 = arith.constant 0 : index
    %96 = vector.load %arg10[%c0_36, %c0_37] : memref<32x32xf32, #tpu.memory_space<vmem>>, vector<32x32xf32>
    tpu.vector_store %arg10[%c0_36, %c0_37], %95 {strides = array<i32>} : memref<32x32xf32, #tpu.memory_space<vmem>>, vector<32x32xf32>,
    return
  }
  func.func @transform_0(%arg0: i32) -> (i32, i32) {
    %c0_i32 = arith.constant 0 : i32
    %c0_i32_0 = arith.constant 0 : i32
    return %arg0, %c0_i32 : i32, i32
  }
  func.func @transform_1(%arg0: i32) -> (i32, i32) {
    %c0_i32 = arith.constant 0 : i32
    %c0_i32_0 = arith.constant 0 : i32
    %c0_i32_1 = arith.constant 0 : i32
    return %c0_i32, %c0_i32_0 : i32, i32
  }
  func.func @transform_2(%arg0: i32) -> (i32, i32) {
    %c0_i32 = arith.constant 0 : i32
    %c0_i32_0 = arith.constant 0 : i32
    %c0_i32_1 = arith.constant 0 : i32
    return %c0_i32, %c0_i32_0 : i32, i32
  }
  func.func @transform_3(%arg0: i32) -> (i32, i32) {
    %c0_i32 = arith.constant 0 : i32
    %c0_i32_0 = arith.constant 0 : i32
    %c0_i32_1 = arith.constant 0 : i32
    return %c0_i32, %c0_i32_0 : i32, i32
  }
  func.func @transform_4(%arg0: i32) -> (i32, i32) {
    %c0_i32 = arith.constant 0 : i32
    %c0_i32_0 = arith.constant 0 : i32
    %c0_i32_1 = arith.constant 0 : i32
    return %c0_i32, %c0_i32_0 : i32, i32
  }
  func.func @transform_5(%arg0: i32) -> (i32, i32) {
    %c0_i32 = arith.constant 0 : i32
    %c0_i32_0 = arith.constant 0 : i32
    %c0_i32_1 = arith.constant 0 : i32
    return %c0_i32, %c0_i32_0 : i32, i32
  }
  func.func @transform_6(%arg0: i32) -> (i32, i32) {
    %c0_i32 = arith.constant 0 : i32
    %c0_i32_0 = arith.constant 0 : i32
    %c0_i32_1 = arith.constant 0 : i32
    return %c0_i32, %c0_i32_0 : i32, i32
  }
  func.func @transform_7(%arg0: i32) -> (i32, i32) {
    %c0_i32 = arith.constant 0 : i32
    %c0_i32_0 = arith.constant 0 : i32
    %c0_i32_1 = arith.constant 0 : i32
    return %c0_i32, %c0_i32_0 : i32, i32
  }
  func.func @transform_8(%arg0: i32) -> (i32, i32) {
    %c0_i32 = arith.constant 0 : i32
    %c0_i32_0 = arith.constant 0 : i32
    %c0_i32_1 = arith.constant 0 : i32
    return %c0_i32, %c0_i32_0 : i32, i32
  }
  func.func @transform_9(%arg0: i32) -> (i32, i32) {
    %c0_i32 = arith.constant 0 : i32
    %c0_i32_0 = arith.constant 0 : i32
    return %arg0, %c0_i32 : i32, i32
  }
}

</mosaic_0001>

<bundles_post_ra>
// kernel: tpu_custom_call.1
= control target key start
LH: loop header
LB: loop body
LE: loop exit
PB: predicated region body
PF: predicated region fallthrough
CT: control target
= control target key end

     0   :  { %vm63_vm0 = vcmask 261120   ;;  %s4045_s0 = inlined_call_operand.vmem [shape: f32[32,32], index: 0, kind: input, shape index: {}]   ;;  %s4046_s1 = inlined_call_operand.vmem [shape: bf16[32,96], index: 1, kind: input, shape index: {}]   ;;  %s4047_s2 = inlined_call_operand.vmem [shape: f32[1,96], index: 2, kind: input, shape index: {}]   ;;  %s4048_s3 = inlined_call_operand.vmem [shape: bf16[32,32], index: 3, kind: input, shape index: {}]   ;;  %s4049_s4 = inlined_call_operand.vmem [shape: f32[1,32], index: 4, kind: input, shape index: {}]   ;;  %s4050_s5 = inlined_call_operand.vmem [shape: bf16[32,256], index: 5, kind: input, shape index: {}]   ;;  %s4051_s6 = inlined_call_operand.vmem [shape: f32[1,256], index: 6, kind: input, shape index: {}]   ;;  %s4052_s7 = inlined_call_operand.vmem [shape: bf16[256,32], index: 7, kind: input, shape index: {}]   ;;  %s4053_s8 = inlined_call_operand.vmem [shape: f32[1,32], index: 8, kind: input, shape index: {}]   ;;  %s4054_s9 = inlined_call_operand.hbm [shape: f32[32,32], index: 9, kind: output, shape index: {}]  }
   0x1   :  { %v2838_v0 = vld [vmem:[%s4046_s1] sm:$0xff]   ;;  %v2839_v1 = vld [vmem:[%s4046_s1 + $0x8] sm:$0xff]   ;;  %v36_v4 = vld [vmem:[%s4045_s0 + $0x10] sm:$0xff] }
   0x2   :  { %2813 = vmatprep.subr.bf16.mxu0 %v2838_v0  ;;  %v34_v2 = vld [vmem:[%s4045_s0] sm:$0xff]  ;;  %v35_v3 = vld [vmem:[%s4045_s0 + $0x8] sm:$0xff]  ;;  %v37_v6 = vld [vmem:[%s4045_s0 + $0x18] sm:$0xff] }
   0x3   :  { %2814 = vmatpush3.bf16.msra.mxu0 %v2838_v0  ;;  %v38_v5 = vpack.c.bf16 %v35_v3, %v34_v2  ;;  %v39_v7 = vpack.c.bf16 %v37_v6, %v36_v4 }
   0x4   :  { %2815 = vmatprep.subr.bf16.mxu0 %v2839_v1 }
   0x5   :  { %2817 = vmatprep.mubr.msk.bf16.mxu0 %vm63_vm0, %v38_v5 }
   0x7   :  { %2816 = vmatpush3.bf16.msra.mxu0 %v2839_v1 }
   0xa   :  { %2818 = vmatmul.mubr.msk.bf16.vlgmr.msra.gmra.mrb[0].mxu0 %vm63_vm0, %v39_v7 }
   0xb   :  { %14 = vsyncpa [#allocation3], 0  ;;  %v2744_v8 = vld [vmem:[%s4047_s2] ss:$0 sm:$0xff]  ;;  %s2988_s22 = smov 96   ;;  %v127_v23 = vlaneseq  ;;  %vm535_vm1 = vcmask 257024  }
   0xc   :  { %v2989_v21 = vmov 1966171168   ;;  %vm826_vm2 = vcmask 1041409   ;;  %vm828_vm3 = vcmask 1042434   ;;  %vm830_vm4 = vcmask 1043459   ;;  %s2991_s2 = smov 64  }
   0xd   :  { %v125_v22 = vunpack.c.l.s4 %v2989_v21  ;;  %v3101_v25 = vshrl.u32 %v127_v23, 7  ;;  %vm861_vm5 = vcmask 27648   ;;  %vm2220_vm6 = vcmask 1044484  }
   0xe   :  { %vm2222_vm7 = vcmask 1045509   ;;  %vm2224_vm8 = vcmask 1046534   ;;  %vm2226_vm9 = vcmask 1047559  }
   0xf   :  { %v126_v24 = vunpack.c.0.s8 %v125_v22  ;;  %v3114_v32 = vsub.s32 0, %v3101_v25 }
  0x11   :  { %v3104_v26 = vsub.s32 %v126_v24, %v3101_v25 }
  0xdd   :  { %v2819_v9 = vpop.f32.mrb[0].mxu0 }
  0xde   :  { %v3068_v10 = vadd.f32 %v2819_v9, %v2744_v8  ;;  %v104_v11 = vpop.f32.mrb[1].mxu0 }
  0xdf   :  { %v3070_v12 = vadd.f32 %v2744_v8, %v104_v11  ;;  %v2820_v13 = vpop.f32.mrb[2].mxu0 }
  0xe0   :  { %487 = vrot.lane.b32.xlu1 %v3068_v10, %s2988_s22  ;;  %v107_v14 = vpop.f32.mrb[3].mxu0  ;;  %v3074_v15 = vadd.f32 %v2820_v13, %v2744_v8  ;;  %v3078_v16 = vcombine.high %v3068_v10, %v3068_v10  ;;  %v228_v27 = vrot.slane %v3068_v10, %v3104_v26 }
  0xe1   :  { %479 = vrot.lane.b32.xlu0 %v3070_v12, %s2988_s22  ;;  %v3082_v17 = vadd.f32 %v2744_v8, %v107_v14  ;;  %v3096_v20 = vcombine.high %v3070_v12, %v3070_v12  ;;  %v130_v31 = vrot.slane %v3070_v12, %v3104_v26 }
  0xe2   :  { %v3086_v18 = vcombine.high %v3074_v15, %v3074_v15  ;;  %v236_v28 = vcombine.high %v228_v27, %v228_v27  ;;  %v277_v29 = vrot.slane %v3074_v15, %v3104_v26  ;;  %v244_v30 = vrot.slane %v228_v27, %v3104_v26 }
  0xe3   :  { %v3092_v19 = vcombine.high %v3082_v17, %v3082_v17  ;;  %v146_v35 = vrot.slane %v130_v31, %v3104_v26  ;;  %v138_v43 = vcombine.high %v130_v31, %v130_v31  ;;  %v235_v53 = vrot.slane %v3078_v16, %v3104_v26 }
  0xe4   :  { %491 = vrot.lane.b32.xlu1 %v3074_v15, %s2988_s22  ;;  %4058 = vst [vmem:[#allocation5_spill] sm:$0xff] %v3086_v18  ;;  %v258_v33 = vrot.slane %v236_v28, %v3104_v26  ;;  %v266_v34 = vcombine.high %v244_v30, %v244_v30  ;;  %v285_v36 = vcombine.high %v277_v29, %v277_v29 }
  0xe5   :  { %489 = vrot.lane.b32.xlu0 %v3078_v16, %s2988_s22  ;;  %v386_v37 = vrot.slane %v244_v30, %v3114_v32  ;;  %v322_v41 = vrot.slane %v146_v35, %v3114_v32  ;;  %v293_v48 = vrot.slane %v277_v29, %v3104_v26  ;;  %v160_v57 = vrot.slane %v138_v43, %v3104_v26 }
  0xe6   :  { %v390_v38 = vrot.slane %v258_v33, %v3114_v32  ;;  %v394_v40 = vrot.slane %v266_v34, %v3114_v32  ;;  %v307_v42 = vrot.slane %v285_v36, %v3104_v26  ;;  %v268_v47 = vcombine.high %v258_v33, %v258_v33 }
  0xe7   :  { %v315_v58 = vcombine.high %v293_v48, %v293_v48  ;;  %v168_v63 = vcombine.high %v146_v35, %v146_v35  ;;  %v326_v0 = vrot.slane %v160_v57, %v3114_v32  ;;  %v237_v3 = vcombine.high %v235_v53, %v235_v53 }
  0xe8   :  { %493 = vrot.lane.b32.xlu1 %v3086_v18, %s2988_s22  ;;  %v398_v55 = vrot.slane %v268_v47, %v3114_v32  ;;  %v422_v56 = vrot.slane %v307_v42, %v3114_v32  ;;  %v317_v2 = vcombine.high %v307_v42, %v307_v42  ;;  %v170_v8 = vcombine.high %v160_v57, %v160_v57 }
  0xe9   :  { %483 = vrot.lane.b32.xlu0 %v3082_v17, %s2988_s22  ;;  %v426_v1 = vrot.slane %v315_v58, %v3114_v32  ;;  %v330_v9 = vrot.slane %v168_v63, %v3114_v32  ;;  %v3140_v13 = vrot.slane %v237_v3, %v3104_v26  ;;  %v179_v14 = vrot.slane %v3082_v17, %v3104_v26 }
  0xea   :  { %v430_v11 = vrot.slane %v317_v2, %v3114_v32  ;;  %v334_v29 = vrot.slane %v170_v8, %v3114_v32 }
  0xeb   :  { %v406_v30 = vrot.slane %v3140_v13, %v3114_v32  ;;  %v195_v31 = vrot.slane %v179_v14, %v3104_v26  ;;  %v187_v33 = vcombine.high %v179_v14, %v179_v14 }
  0xec   :  { %485 = vrot.lane.b32.xlu1 %v3092_v19, %s2988_s22 }
  0xed   :  { %481 = vrot.lane.b32.xlu0 %v3096_v20, %s2988_s22  ;;  %v209_v42 = vrot.slane %v187_v33, %v3104_v26 }
 0x152   :  { %v488_v39 = vpop.permute.xlu1 %487 }
 0x153   :  { %v480_v44 = vpop.permute.xlu0 %479  ;;  %v519_v45 = vmul.f32 %v488_v39, %v386_v37  ;;  %v520_v46 = vmul.f32 %v488_v39, %v390_v38  ;;  %v521_v51 = vmul.f32 %v488_v39, %v394_v40  ;;  %v522_v61 = vmul.f32 %v488_v39, %v398_v55 }
 0x154   :  { %v503_v52 = vmul.f32 %v480_v44, %v322_v41  ;;  %v504_v6 = vmul.f32 %v480_v44, %v326_v0  ;;  %v505_v27 = vmul.f32 %v480_v44, %v330_v9  ;;  %v506_v36 = vmul.f32 %v480_v44, %v334_v29 }
 0x155   :  { %v584_v49 = vsel %vm535_vm1, %v519_v45, 0.0  ;;  %v587_v50 = vsel %vm535_vm1, %v520_v46, 0.0  ;;  %v590_v59 = vsel %vm535_vm1, %v521_v51, 0.0  ;;  %v593_v4 = vsel %vm535_vm1, %v522_v61, 0.0 }
 0x156   :  { %v492_v54 = vpop.permute.xlu1 %491  ;;  %585 = vadd.xlane.f32.xlu1 %v584_v49  ;;  %588 = vadd.xlane.f32.xlu0 %v587_v50  ;;  %v536_v60 = vsel %vm535_vm1, %v503_v52, 0.0  ;;  %v539_v22 = vsel %vm535_vm1, %v504_v6, 0.0  ;;  %v542_v34 = vsel %vm535_vm1, %v505_v27, 0.0  ;;  %v418_v39 = vrot.slane %v293_v48, %v3114_v32 }
 0x157   :  { %v528_v62 = vmul.f32 %v492_v54, %v422_v56  ;;  %v529_v7 = vmul.f32 %v492_v54, %v426_v1  ;;  %v3144_v21 = vpop.permute.xlu0 %489  ;;  %v530_v28 = vmul.f32 %v492_v54, %v430_v11  ;;  %v354_v40 = vrot.slane %v195_v31, %v3114_v32 }
 0x158   :  { %v524_v37 = vmul.f32 %v3144_v21, %v406_v30  ;;  %v251_v41 = vrot.slane %v235_v53, %v3104_v26  ;;  %v545_v43 = vsel %vm535_vm1, %v506_v36, 0.0  ;;  %v527_v46 = vmul.f32 %v492_v54, %v418_v39 }
 0x159   :  { %v611_v5 = vsel %vm535_vm1, %v528_v62, 0.0  ;;  %v614_v24 = vsel %vm535_vm1, %v529_v7, 0.0  ;;  %v617_v35 = vsel %vm535_vm1, %v530_v28, 0.0  ;;  %v137_v44 = vrot.slane %v3096_v20, %v3104_v26 }
 0x15a   :  { %591 = vadd.xlane.f32.xlu1 %v590_v59  ;;  %537 = vadd.xlane.f32.xlu0 %v536_v60  ;;  %v599_v45 = vsel %vm535_vm1, %v524_v37, 0.0  ;;  %v402_v49 = vrot.slane %v251_v41, %v3114_v32  ;;  %v358_v48 = vrot.slane %v209_v42, %v3114_v32  ;;  %v267_v50 = vcombine.high %v251_v41, %v251_v41  ;;  %v494_v36 = vpop.permute.xlu1 %493 }
 0x15b   :  { %v484_v38 = vpop.permute.xlu0 %483  ;;  %v217_v51 = vcombine.high %v195_v31, %v195_v31  ;;  %v608_v52 = vsel %vm535_vm1, %v527_v46, 0.0  ;;  %v284_v54 = vrot.slane %v3086_v18, %v3104_v26  ;;  %v153_v57 = vrot.slane %v137_v44, %v3104_v26 }
 0x15c   :  { %v511_v47 = vmul.f32 %v484_v38, %v354_v40  ;;  %v523_v55 = vmul.f32 %v3144_v21, %v402_v49  ;;  %v512_v56 = vmul.f32 %v484_v38, %v358_v48  ;;  %v410_v58 = vrot.slane %v267_v50, %v3114_v32 }
 0x15d   :  { %v362_v59 = vrot.slane %v217_v51, %v3114_v32  ;;  %v219_v60 = vcombine.high %v209_v42, %v209_v42  ;;  %v139_v61 = vcombine.high %v137_v44, %v137_v44  ;;  %v286_v3 = vcombine.high %v284_v54, %v284_v54 }
 0x15e   :  { %594 = vadd.xlane.f32.xlu1 %v593_v4  ;;  %612 = vadd.xlane.f32.xlu0 %v611_v5  ;;  %v560_v53 = vsel %vm535_vm1, %v511_v47, 0.0  ;;  %v596_v62 = vsel %vm535_vm1, %v523_v55, 0.0  ;;  %v563_v63 = vsel %vm535_vm1, %v512_v56, 0.0  ;;  %v525_v0 = vmul.f32 %v3144_v21, %v410_v58 }
 0x15f   :  { %v513_v1 = vmul.f32 %v484_v38, %v362_v59  ;;  %v482_v2 = vpop.permute.xlu0 %481  ;;  %v366_v4 = vrot.slane %v219_v60, %v3114_v32  ;;  %v338_v5 = vrot.slane %v153_v57, %v3114_v32  ;;  %v169_v6 = vcombine.high %v153_v57, %v153_v57 }
 0x160   :  { %v167_v7 = vrot.slane %v139_v61, %v3104_v26  ;;  %v602_v8 = vsel %vm535_vm1, %v525_v0, 0.0  ;;  %v314_v29 = vrot.slane %v286_v3, %v3104_v26  ;;  %v269_v57 = vcombine.high %v3140_v13, %v3140_v13 }
 0x161   :  { %v566_v9 = vsel %vm535_vm1, %v513_v1, 0.0  ;;  %v514_v11 = vmul.f32 %v484_v38, %v366_v4  ;;  %v507_v14 = vmul.f32 %v482_v2, %v338_v5  ;;  %v346_v27 = vrot.slane %v169_v6, %v3114_v32 }
 0x162   :  { %540 = vadd.xlane.f32.xlu1 %v539_v22  ;;  %615 = vadd.xlane.f32.xlu0 %v614_v24  ;;  %v186_v22 = vrot.slane %v3092_v19, %v3104_v26  ;;  %v300_v24 = vrot.slane %v284_v54, %v3104_v26  ;;  %v342_v28 = vrot.slane %v167_v7, %v3114_v32 }
 0x163   :  { %v171_v30 = vcombine.high %v167_v7, %v167_v7  ;;  %v569_v31 = vsel %vm535_vm1, %v514_v11, 0.0  ;;  %v548_v33 = vsel %vm535_vm1, %v507_v14, 0.0  ;;  %v438_v37 = vrot.slane %v314_v29, %v3114_v32 }
 0x164   :  { %v316_v39 = vcombine.high %v300_v24, %v300_v24  ;;  %v188_v40 = vcombine.high %v186_v22, %v186_v22  ;;  %v434_v47 = vrot.slane %v300_v24, %v3114_v32  ;;  %v202_v49 = vrot.slane %v186_v22, %v3104_v26 }
 0x165   :  { %v350_v38 = vrot.slane %v171_v30, %v3114_v32  ;;  %v318_v4 = vcombine.high %v314_v29, %v314_v29  ;;  %v697_v14 = vand.u32 127, %v127_v23 }
 0x166   :  { %543 = vadd.xlane.f32.xlu1 %v542_v34  ;;  %618 = vadd.xlane.f32.xlu0 %v617_v35  ;;  %v509_v34 = vmul.f32 %v482_v2, %v346_v27  ;;  %v508_v35 = vmul.f32 %v482_v2, %v342_v28  ;;  %v442_v46 = vrot.slane %v316_v39, %v3114_v32 }
 0x167   :  { %v216_v44 = vrot.slane %v188_v40, %v3104_v26  ;;  %v370_v56 = vrot.slane %v202_v49, %v3114_v32  ;;  %v218_v54 = vcombine.high %v202_v49, %v202_v49  ;;  %v3218_v27 = vsub.s32 %v697_v14, %v3101_v25 }
 0x168   :  { %v554_v41 = vsel %vm535_vm1, %v509_v34, 0.0  ;;  %v551_v42 = vsel %vm535_vm1, %v508_v35, 0.0  ;;  %v533_v51 = vmul.f32 %v494_v36, %v442_v46 }
 0x169   :  { %v374_v55 = vrot.slane %v216_v44, %v3114_v32  ;;  %v378_v61 = vrot.slane %v218_v54, %v3114_v32 }
 0x16a   :  { %546 = vadd.xlane.f32.xlu1 %v545_v43  ;;  %600 = vadd.xlane.f32.xlu0 %v599_v45  ;;  %v532_v43 = vmul.f32 %v494_v36, %v438_v37  ;;  %v510_v45 = vmul.f32 %v482_v2, %v350_v38  ;;  %v626_v58 = vsel %vm535_vm1, %v533_v51, 0.0 }
 0x16c   :  { %v623_v48 = vsel %vm535_vm1, %v532_v43, 0.0  ;;  %v557_v50 = vsel %vm535_vm1, %v510_v45, 0.0 }
 0x16e   :  { %609 = vadd.xlane.f32.xlu1 %v608_v52  ;;  %561 = vadd.xlane.f32.xlu0 %v560_v53  ;;  %v531_v52 = vmul.f32 %v494_v36, %v434_v47  ;;  %v486_v53 = vpop.permute.xlu1 %485 }
 0x16f   :  { %v516_v59 = vmul.f32 %v486_v53, %v374_v55  ;;  %v515_v60 = vmul.f32 %v486_v53, %v370_v56  ;;  %v517_v2 = vmul.f32 %v486_v53, %v378_v61 }
 0x170   :  { %v620_v26 = vsel %vm535_vm1, %v531_v52, 0.0 }
 0x171   :  { %v575_v0 = vsel %vm535_vm1, %v516_v59, 0.0  ;;  %v572_v1 = vsel %vm535_vm1, %v515_v60, 0.0  ;;  %v578_v5 = vsel %vm535_vm1, %v517_v2, 0.0 }
 0x172   :  { %597 = vadd.xlane.f32.xlu1 %v596_v62  ;;  %564 = vadd.xlane.f32.xlu0 %v563_v63  ;;  %v414_v62 = vrot.slane %v269_v57, %v3114_v32  ;;  %v220_v63 = vcombine.high %v216_v44, %v216_v44 }
 0x174   :  { %v526_v13 = vmul.f32 %v3144_v21, %v414_v62  ;;  %v382_v3 = vrot.slane %v220_v63, %v3114_v32 }
 0x176   :  { %603 = vadd.xlane.f32.xlu1 %v602_v8  ;;  %567 = vadd.xlane.f32.xlu0 %v566_v9  ;;  %v605_v6 = vsel %vm535_vm1, %v526_v13, 0.0  ;;  %v518_v7 = vmul.f32 %v486_v53, %v382_v3  ;;  %v446_v8 = vrot.slane %v318_v4, %v3114_v32 }
 0x178   :  { %v581_v9 = vsel %vm535_vm1, %v518_v7, 0.0  ;;  %v534_v11 = vmul.f32 %v494_v36, %v446_v8 }
 0x17a   :  { %570 = vadd.xlane.f32.xlu0 %v569_v31  ;;  %549 = vadd.xlane.f32.xlu1 %v548_v33  ;;  %v629_v21 = vsel %vm535_vm1, %v534_v11, 0.0 }
 0x17e   :  { %555 = vadd.xlane.f32.xlu1 %v554_v41  ;;  %552 = vadd.xlane.f32.xlu0 %v551_v42 }
 0x182   :  { %624 = vadd.xlane.f32.xlu0 %v623_v48  ;;  %558 = vadd.xlane.f32.xlu1 %v557_v50 }
 0x186   :  { %627 = vadd.xlane.f32.xlu0 %v626_v58  ;;  %621 = vadd.xlane.f32.xlu1 %v620_v26 }
 0x18a   :  { %576 = vadd.xlane.f32.xlu0 %v575_v0  ;;  %573 = vadd.xlane.f32.xlu1 %v572_v1 }
 0x18e   :  { %579 = vadd.xlane.f32.xlu0 %v578_v5  ;;  %606 = vadd.xlane.f32.xlu1 %v605_v6 }
 0x192   :  { %582 = vadd.xlane.f32.xlu0 %v581_v9 }
 0x196   :  { %630 = vadd.xlane.f32.xlu0 %v629_v21 }
 0x1e3   :  { %v586_v22 = vpop.xlane.xlu1 %585  ;;  %v589_v24 = vpop.xlane.xlu0 %588 }
 0x1e4   :  { %v3220_v28 = vmul.f32 0.35355338, %v586_v22  ;;  %v3222_v29 = vmul.f32 0.35355338, %v589_v24 }
 0x1e6   :  { %v765_v34 = vrot.slane %v3220_v28, %v3218_v27  ;;  %v769_v35 = vrot.slane %v3222_v29, %v3218_v27 }
 0x1e7   :  { %v592_v30 = vpop.xlane.xlu1 %591  ;;  %v538_v31 = vpop.xlane.xlu0 %537 }
 0x1e8   :  { %v3224_v33 = vmul.f32 0.35355338, %v592_v30  ;;  %v841_v40 = vsel %vm826_vm2, %v769_v35, %v765_v34  ;;  %v3242_v48 = vmul.f32 0.35355338, %v538_v31 }
 0x1ea   :  { %v773_v23 = vrot.slane %v3224_v33, %v3218_v27  ;;  %v701_v56 = vrot.slane %v3242_v48, %v3218_v27 }
 0x1eb   :  { %v595_v36 = vpop.xlane.xlu1 %594  ;;  %v613_v37 = vpop.xlane.xlu0 %612 }
 0x1ec   :  { %v3232_v38 = vmul.f32 0.35355338, %v595_v36  ;;  %v842_v43 = vsel %vm828_vm3, %v773_v23, %v841_v40  ;;  %v3254_v57 = vmul.f32 0.35355338, %v613_v37 }
 0x1ee   :  { %v777_v39 = vrot.slane %v3232_v38, %v3218_v27  ;;  %v801_v13 = vrot.slane %v3254_v57, %v3218_v27 }
 0x1ef   :  { %v541_v41 = vpop.xlane.xlu1 %540  ;;  %v616_v42 = vpop.xlane.xlu0 %615 }
 0x1f0   :  { %v843_v45 = vsel %vm830_vm4, %v777_v39, %v842_v43  ;;  %v3240_v47 = vmul.f32 0.35355338, %v541_v41  ;;  %v3259_v59 = vmul.f32 0.35355338, %v616_v42 }
 0x1f1   :  { %v874_v46 = vsel %vm861_vm5, %v843_v45, -inf }
 0x1f2   :  { %875 = vmax.xlane.f32.xlu1 %v874_v46  ;;  %v705_v51 = vrot.slane %v3240_v47, %v3218_v27  ;;  %v805_v4 = vrot.slane %v3259_v59, %v3218_v27 }
 0x1f3   :  { %v544_v44 = vpop.xlane.xlu1 %543  ;;  %v619_v49 = vpop.xlane.xlu0 %618 }
 0x1f4   :  { %v3244_v50 = vmul.f32 0.35355338, %v544_v44  ;;  %v827_v26 = vsel %vm826_vm2, %v705_v51, %v701_v56  ;;  %v3262_v63 = vmul.f32 0.35355338, %v619_v49 }
 0x1f6   :  { %v709_v52 = vrot.slane %v3244_v50, %v3218_v27  ;;  %v809_v7 = vrot.slane %v3262_v63, %v3218_v27 }
 0x1f7   :  { %v547_v53 = vpop.xlane.xlu1 %546  ;;  %v601_v55 = vpop.xlane.xlu0 %600 }
 0x1f8   :  { %v3252_v54 = vmul.f32 0.35355338, %v547_v53  ;;  %v829_v62 = vsel %vm828_vm3, %v709_v52, %v827_v26  ;;  %v4055_v26 = vmov 0  }
 0x1f9   :  { %2837 = vset.pattern.permute.xlu0 %v4055_v26  ;;  %2836 = vset.pattern.permute.xlu1 %v4055_v26 }
 0x1fa   :  { %v713_v58 = vrot.slane %v3252_v54, %v3218_v27 }
 0x1fb   :  { %v610_v60 = vpop.xlane.xlu1 %609  ;;  %v562_v61 = vpop.xlane.xlu0 %561 }
 0x1fc   :  { %v3264_v0 = vmul.f32 0.35355338, %v610_v60  ;;  %v831_v1 = vsel %vm830_vm4, %v713_v58, %v829_v62  ;;  %v3282_v30 = vmul.f32 0.35355338, %v562_v61  ;;  %v3306_v60 = vmul.f32 0.35355338, %v601_v55 }
 0x1fd   :  { %v862_v2 = vsel %vm861_vm5, %v831_v1, -inf }
 0x1fe   :  { %v797_v3 = vrot.slane %v3264_v0, %v3218_v27  ;;  %863 = vmax.xlane.f32.xlu1 %v862_v2  ;;  %v733_v37 = vrot.slane %v3282_v30, %v3218_v27 }
 0x1ff   :  { %v598_v5 = vpop.xlane.xlu1 %597  ;;  %v565_v6 = vpop.xlane.xlu0 %564 }
 0x200   :  { %v847_v8 = vsel %vm826_vm2, %v801_v13, %v797_v3  ;;  %v3278_v11 = vmul.f32 0.35355338, %v565_v6  ;;  %v3300_v56 = vmul.f32 0.35355338, %v598_v5 }
 0x201   :  { %v848_v9 = vsel %vm828_vm3, %v805_v4, %v847_v8 }
 0x202   :  { %v849_v21 = vsel %vm830_vm4, %v809_v7, %v848_v9  ;;  %v737_v34 = vrot.slane %v3278_v11, %v3218_v27  ;;  %v781_v13 = vrot.slane %v3300_v56, %v3218_v27  ;;  %v785_v7 = vrot.slane %v3306_v60, %v3218_v27 }
 0x203   :  { %v604_v14 = vpop.xlane.xlu1 %603  ;;  %v568_v22 = vpop.xlane.xlu0 %567  ;;  %v880_v24 = vsel %vm861_vm5, %v849_v21, -inf }
 0x204   :  { %v3284_v31 = vmul.f32 0.35355338, %v568_v22  ;;  %881 = vmax.xlane.f32.xlu0 %v880_v24  ;;  %v835_v41 = vsel %vm826_vm2, %v737_v34, %v733_v37  ;;  %v3308_v61 = vmul.f32 0.35355338, %v604_v14 }
 0x206   :  { %v741_v35 = vrot.slane %v3284_v31, %v3218_v27  ;;  %v789_v8 = vrot.slane %v3308_v61, %v3218_v27 }
 0x207   :  { %v571_v23 = vpop.xlane.xlu0 %570  ;;  %v550_v36 = vpop.xlane.xlu1 %549 }
 0x208   :  { %v3292_v39 = vmul.f32 0.35355338, %v571_v23  ;;  %v836_v45 = vsel %vm828_vm3, %v741_v35, %v835_v41  ;;  %v3310_v62 = vmul.f32 0.35355338, %v550_v36  ;;  %v844_v36 = vsel %vm826_vm2, %v785_v7, %v781_v13 }
 0x20a   :  { %v745_v40 = vrot.slane %v3292_v39, %v3218_v27  ;;  %v717_v9 = vrot.slane %v3310_v62, %v3218_v27 }
 0x20b   :  { %v556_v42 = vpop.xlane.xlu1 %555  ;;  %v553_v43 = vpop.xlane.xlu0 %552 }
 0x20c   :  { %v837_v46 = vsel %vm830_vm4, %v745_v40, %v836_v45  ;;  %v3302_v58 = vmul.f32 0.35355338, %v553_v43  ;;  %v3314_v3 = vmul.f32 0.35355338, %v556_v42 }
 0x20d   :  { %v868_v44 = vsel %vm861_vm5, %v837_v46, -inf }
 0x20e   :  { %869 = vmax.xlane.f32.xlu0 %v868_v44  ;;  %v721_v4 = vrot.slane %v3302_v58, %v3218_v27  ;;  %v725_v35 = vrot.slane %v3314_v3, %v3218_v27 }
 0x20f   :  { %v625_v49 = vpop.xlane.xlu0 %624  ;;  %v559_v51 = vpop.xlane.xlu1 %558 }
 0x210   :  { %v3318_v5 = vmul.f32 0.35355338, %v559_v51  ;;  %v3338_v23 = vmul.f32 0.35355338, %v625_v49  ;;  %v832_v37 = vsel %vm826_vm2, %v721_v4, %v717_v9  ;;  %v845_v49 = vsel %vm828_vm3, %v789_v8, %v844_v36 }
 0x211   :  { %v833_v13 = vsel %vm828_vm3, %v725_v35, %v832_v37 }
 0x212   :  { %v729_v40 = vrot.slane %v3318_v5, %v3218_v27 }
 0x213   :  { %v628_v52 = vpop.xlane.xlu0 %627  ;;  %v622_v53 = vpop.xlane.xlu1 %621 }
 0x214   :  { %v3330_v22 = vmul.f32 0.35355338, %v622_v53  ;;  %v3350_v45 = vmul.f32 0.35355338, %v628_v52  ;;  %v817_v52 = vrot.slane %v3338_v23, %v3218_v27  ;;  %v834_v8 = vsel %vm830_vm4, %v729_v40, %v833_v13 }
 0x216   :  { %v813_v51 = vrot.slane %v3330_v22, %v3218_v27  ;;  %v821_v9 = vrot.slane %v3350_v45, %v3218_v27 }
 0x217   :  { %v577_v1 = vpop.xlane.xlu0 %576  ;;  %v574_v2 = vpop.xlane.xlu1 %573 }
 0x218   :  { %v3320_v6 = vmul.f32 0.35355338, %v577_v1  ;;  %v3322_v55 = vmul.f32 0.35355338, %v574_v2  ;;  %v850_v37 = vsel %vm826_vm2, %v817_v52, %v813_v51  ;;  %v3386_v51 = vsub.s32 2, %v3101_v25 }
 0x219   :  { %v851_v40 = vsel %vm828_vm3, %v821_v9, %v850_v37 }
 0x21a   :  { %v753_v41 = vrot.slane %v3320_v6, %v3218_v27  ;;  %v749_v42 = vrot.slane %v3322_v55, %v3218_v27 }
 0x21b   :  { %v580_v21 = vpop.xlane.xlu0 %579  ;;  %v607_v14 = vpop.xlane.xlu1 %606 }
 0x21c   :  { %v3332_v24 = vmul.f32 0.35355338, %v580_v21  ;;  %v3334_v34 = vmul.f32 0.35355338, %v607_v14  ;;  %v838_v7 = vsel %vm826_vm2, %v753_v41, %v749_v42 }
 0x21e   :  { %v793_v43 = vrot.slane %v3334_v34, %v3218_v27  ;;  %v757_v46 = vrot.slane %v3332_v24, %v3218_v27 }
 0x21f   :  { %v583_v44 = vpop.xlane.xlu0 %582 }
 0x220   :  { %v3357_v53 = vmul.f32 0.35355338, %v583_v44  ;;  %v846_v1 = vsel %vm830_vm4, %v793_v43, %v845_v49  ;;  %v839_v14 = vsel %vm828_vm3, %v757_v46, %v838_v7  ;;  %v865_v44 = vsel %vm861_vm5, %v834_v8, -inf }
 0x221   :  { %v877_v2 = vsel %vm861_vm5, %v846_v1, -inf  ;;  %v3383_v49 = vsub.s32 1, %v3101_v25  ;;  %v3389_v1 = vsub.s32 3, %v3101_v25 }
 0x222   :  { %v761_v4 = vrot.slane %v3357_v53, %v3218_v27  ;;  %878 = vmax.xlane.f32.xlu1 %v877_v2 }
 0x223   :  { %v631_v21 = vpop.xlane.xlu0 %630 }
 0x224   :  { %v3371_v36 = vmul.f32 0.35355338, %v631_v21  ;;  %v840_v35 = vsel %vm830_vm4, %v761_v4, %v839_v14 }
 0x225   :  { %v871_v43 = vsel %vm861_vm5, %v840_v35, -inf }
 0x226   :  { %v825_v41 = vrot.slane %v3371_v36, %v3218_v27  ;;  %872 = vmax.xlane.f32.xlu0 %v871_v43  ;;  %866 = vmax.xlane.f32.xlu1 %v865_v44 }
 0x228   :  { %v852_v42 = vsel %vm830_vm4, %v825_v41, %v851_v40 }
 0x229   :  { %v883_v46 = vsel %vm861_vm5, %v852_v42, -inf }
 0x22a   :  { %884 = vmax.xlane.f32.xlu0 %v883_v46 }
 0x27f   :  { %v876_v2 = vpop.xlane.xlu1 %875 }
 0x280   :  { %v961_v13 = vrot.slane %v876_v2, %v3114_v32  ;;  %v965_v52 = vrot.slane %v876_v2, %v3383_v49  ;;  %v969_v4 = vrot.slane %v876_v2, %v3386_v51  ;;  %v973_v7 = vrot.slane %v876_v2, %v3389_v1 }
 0x282   :  { %v1070_v8 = vsub.f32 %v3220_v28, %v961_v13  ;;  %v1071_v9 = vsub.f32 %v3222_v29, %v965_v52  ;;  %v1072_v21 = vsub.f32 %v3224_v33, %v969_v4  ;;  %v1073_v14 = vsub.f32 %v3232_v38, %v973_v7 }
 0x284   :  { %v1118_v35 = vmul.f32 1.442695, %v1070_v8  ;;  %v1122_v25 = vmul.f32 1.442695, %v1072_v21  ;;  %v1120_v37 = vmul.f32 1.442695, %v1071_v9 }
 0x285   :  { %v1124_v43 = vmul.f32 1.442695, %v1073_v14 }
 0x286   :  { %2864 = vpow2.f32 %v1118_v35 }
 0x287   :  { %2866 = vpow2.f32 %v1122_v25 }
 0x288   :  { %2868 = vpow2.f32 %v1120_v37 }
 0x289   :  { %2870 = vpow2.f32 %v1124_v43 }
 0x28b   :  { %v864_v44 = vpop.xlane.xlu1 %863 }
 0x28c   :  { %v897_v41 = vrot.slane %v864_v44, %v3114_v32  ;;  %v901_v40 = vrot.slane %v864_v44, %v3383_v49  ;;  %v905_v28 = vrot.slane %v864_v44, %v3386_v51  ;;  %v909_v29 = vrot.slane %v864_v44, %v3389_v1 }
 0x28e   :  { %v1054_v33 = vsub.f32 %v3242_v48, %v897_v41  ;;  %v1055_v38 = vsub.f32 %v3240_v47, %v901_v40  ;;  %v1056_v42 = vsub.f32 %v3244_v50, %v905_v28  ;;  %v1057_v46 = vsub.f32 %v3252_v54, %v909_v29 }
 0x290   :  { %v3407_v2 = vpop.eup %2864  ;;  %v1086_v13 = vmul.f32 1.442695, %v1054_v33  ;;  %v1088_v52 = vmul.f32 1.442695, %v1055_v38  ;;  %v1090_v8 = vmul.f32 1.442695, %v1056_v42 }
 0x291   :  { %v882_v4 = vpop.xlane.xlu0 %881  ;;  %1231 = vperm.xlu1 %2836, %v3407_v2   ;;  %v3410_v7 = vpop.eup %2866  ;;  %v1092_v47 = vmul.f32 1.442695, %v1057_v46 }
 0x292   :  { %2872 = vpow2.f32 %v1086_v13  ;;  %v993_v9 = vrot.slane %v882_v4, %v3114_v32  ;;  %v997_v48 = vrot.slane %v882_v4, %v3383_v49  ;;  %1237 = vperm.xlu0 %2837, %v3410_v7   ;;  %v3415_v50 = vpop.eup %2868  ;;  %v1001_v14 = vrot.slane %v882_v4, %v3386_v51 }
 0x293   :  { %2874 = vpow2.f32 %v1088_v52  ;;  %v3418_v21 = vpop.eup %2870  ;;  %v1005_v37 = vrot.slane %v882_v4, %v3389_v1 }
 0x294   :  { %v1078_v54 = vsub.f32 %v3264_v0, %v993_v9  ;;  %2876 = vpow2.f32 %v1090_v8  ;;  %v1079_v35 = vsub.f32 %v3254_v57, %v997_v48  ;;  %v1080_v43 = vsub.f32 %v3259_v59, %v1001_v14 }
 0x295   :  { %1234 = vperm.xlu1 %2836, %v3415_v50   ;;  %2878 = vpow2.f32 %v1092_v47  ;;  %v1081_v40 = vsub.f32 %v3262_v63, %v1005_v37 }
 0x296   :  { %v1134_v25 = vmul.f32 1.442695, %v1078_v54  ;;  %1240 = vperm.xlu0 %2837, %v3418_v21   ;;  %v1136_v44 = vmul.f32 1.442695, %v1079_v35  ;;  %v1138_v57 = vmul.f32 1.442695, %v1080_v43 }
 0x297   :  { %v1140_v59 = vmul.f32 1.442695, %v1081_v40 }
 0x298   :  { %2880 = vpow2.f32 %v1134_v25 }
 0x299   :  { %2882 = vpow2.f32 %v1136_v44 }
 0x29a   :  { %2884 = vpow2.f32 %v1138_v57 }
 0x29b   :  { %2886 = vpow2.f32 %v1140_v59  ;;  %v870_v42 = vpop.xlane.xlu0 %869 }
 0x29c   :  { %v3426_v0 = vpop.eup %2872  ;;  %v929_v46 = vrot.slane %v870_v42, %v3114_v32  ;;  %v933_v14 = vrot.slane %v870_v42, %v3383_v49  ;;  %v937_v59 = vrot.slane %v870_v42, %v3386_v51 }
 0x29d   :  { %v3428_v41 = vpop.eup %2874  ;;  %1183 = vperm.xlu1 %2836, %v3426_v0  }
 0x29e   :  { %1186 = vperm.xlu0 %2837, %v3428_v41   ;;  %v3433_v28 = vpop.eup %2876  ;;  %v1062_v35 = vsub.f32 %v3282_v30, %v929_v46 }
 0x29f   :  { %v3435_v29 = vpop.eup %2878 }
 0x2a1   :  { %1189 = vperm.xlu1 %2836, %v3433_v28  }
 0x2a2   :  { %1192 = vperm.xlu0 %2837, %v3435_v29   ;;  %v3439_v33 = vpop.eup %2880 }
 0x2a3   :  { %v3442_v63 = vpop.eup %2882 }
 0x2a4   :  { %v3445_v38 = vpop.eup %2884 }
 0x2a5   :  { %1255 = vperm.xlu1 %2836, %v3439_v33   ;;  %v3451_v52 = vpop.eup %2886 }
 0x2a9   :  { %1258 = vperm.xlu1 %2836, %v3442_v63  }
 0x2ad   :  { %1261 = vperm.xlu1 %2836, %v3445_v38  }
 0x2af   :  { %v3449_v13 = vpop.xlane.xlu1 %878 }
 0x2b0   :  { %v977_v4 = vrot.slane %v3449_v13, %v3114_v32  ;;  %v981_v8 = vrot.slane %v3449_v13, %v3383_v49  ;;  %v985_v9 = vrot.slane %v3449_v13, %v3386_v51 }
 0x2b1   :  { %1264 = vperm.xlu1 %2836, %v3451_v52  }
 0x2b2   :  { %v1074_v48 = vsub.f32 %v3300_v56, %v977_v4  ;;  %v1075_v47 = vsub.f32 %v3306_v60, %v981_v8  ;;  %v1076_v54 = vsub.f32 %v3308_v61, %v985_v9  ;;  %v1063_v56 = vsub.f32 %v3278_v11, %v933_v14 }
 0x2b3   :  { %v867_v25 = vpop.xlane.xlu1 %866  ;;  %v3465_v44 = vpop.xlane.xlu0 %872  ;;  %v1102_v60 = vmul.f32 1.442695, %v1062_v35  ;;  %v941_v8 = vrot.slane %v870_v42, %v3389_v1  ;;  %v1064_v9 = vsub.f32 %v3284_v31, %v937_v59 }
 0x2b4   :  { %v1126_v37 = vmul.f32 1.442695, %v1074_v48  ;;  %v1128_v43 = vmul.f32 1.442695, %v1075_v47  ;;  %v1130_v40 = vmul.f32 1.442695, %v1076_v54  ;;  %v913_v57 = vrot.slane %v867_v25, %v3114_v32 }
 0x2b5   :  { %v921_v61 = vrot.slane %v867_v25, %v3386_v51  ;;  %v925_v30 = vrot.slane %v867_v25, %v3389_v1  ;;  %v1104_v48 = vmul.f32 1.442695, %v1063_v56  ;;  %v917_v42 = vrot.slane %v867_v25, %v3383_v49 }
 0x2b6   :  { %2888 = vpow2.f32 %v1126_v37  ;;  %v1058_v46 = vsub.f32 %v3310_v62, %v913_v57  ;;  %v1065_v62 = vsub.f32 %v3292_v39, %v941_v8 }
 0x2b7   :  { %2890 = vpow2.f32 %v1128_v43  ;;  %v1060_v4 = vsub.f32 %v3314_v3, %v921_v61  ;;  %v3476_v47 = vpop.xlane.xlu0 %884  ;;  %v1061_v54 = vsub.f32 %v3318_v5, %v925_v30  ;;  %v1106_v3 = vmul.f32 1.442695, %v1064_v9 }
 0x2b8   :  { %2892 = vpow2.f32 %v1130_v40  ;;  %v1094_v11 = vmul.f32 1.442695, %v1058_v46  ;;  %v1009_v35 = vrot.slane %v3476_v47, %v3114_v32  ;;  %v945_v5 = vrot.slane %v3465_v44, %v3114_v32 }
 0x2b9   :  { %2894 = vpow2.f32 %v1102_v60  ;;  %v1098_v14 = vmul.f32 1.442695, %v1060_v4  ;;  %v1100_v43 = vmul.f32 1.442695, %v1061_v54  ;;  %v1108_v39 = vmul.f32 1.442695, %v1065_v62 }
 0x2ba   :  { %2896 = vpow2.f32 %v1094_v11  ;;  %v1082_v40 = vsub.f32 %v3330_v22, %v1009_v35  ;;  %v1059_v57 = vsub.f32 %v3302_v58, %v917_v42  ;;  %v1013_v25 = vrot.slane %v3476_v47, %v3383_v49 }
 0x2bb   :  { %2898 = vpow2.f32 %v1104_v48  ;;  %v989_v60 = vrot.slane %v3449_v13, %v3389_v1  ;;  %v1066_v22 = vsub.f32 %v3322_v55, %v945_v5  ;;  %v1017_v30 = vrot.slane %v3476_v47, %v3386_v51 }
 0x2bc   :  { %2900 = vpow2.f32 %v1098_v14  ;;  %v1142_v61 = vmul.f32 1.442695, %v1082_v40  ;;  %v1096_v58 = vmul.f32 1.442695, %v1059_v57  ;;  %v1083_v46 = vsub.f32 %v3338_v23, %v1013_v25 }
 0x2bd   :  { %2902 = vpow2.f32 %v1106_v3  ;;  %v1077_v13 = vsub.f32 %v3334_v34, %v989_v60  ;;  %v1110_v55 = vmul.f32 1.442695, %v1066_v22  ;;  %v949_v9 = vrot.slane %v3465_v44, %v3383_v49 }
 0x2be   :  { %2904 = vpow2.f32 %v1100_v43  ;;  %v1084_v48 = vsub.f32 %v3350_v45, %v1017_v30  ;;  %v1144_v11 = vmul.f32 1.442695, %v1083_v46  ;;  %v953_v34 = vrot.slane %v3465_v44, %v3386_v51 }
 0x2bf   :  { %2906 = vpow2.f32 %v1108_v39  ;;  %v1132_v14 = vmul.f32 1.442695, %v1077_v13  ;;  %v1067_v35 = vsub.f32 %v3320_v6, %v949_v9  ;;  %v957_v42 = vrot.slane %v3465_v44, %v3389_v1 }
 0x2c0   :  { %v3483_v37 = vpop.eup %2888  ;;  %2908 = vpow2.f32 %v1142_v61  ;;  %v1146_v62 = vmul.f32 1.442695, %v1084_v48  ;;  %v1068_v5 = vsub.f32 %v3332_v24, %v953_v34  ;;  %v1021_v25 = vrot.slane %v3476_v47, %v3389_v1 }
 0x2c1   :  { %v3485_v31 = vpop.eup %2890  ;;  %1243 = vperm.xlu0 %2837, %v3483_v37   ;;  %2910 = vpow2.f32 %v1096_v58  ;;  %v1112_v43 = vmul.f32 1.442695, %v1067_v35  ;;  %v1069_v39 = vsub.f32 %v3357_v53, %v957_v42 }
 0x2c2   :  { %1246 = vperm.xlu1 %2836, %v3485_v31   ;;  %v3495_v59 = vpop.eup %2892  ;;  %2912 = vpow2.f32 %v1110_v55  ;;  %v1114_v57 = vmul.f32 1.442695, %v1068_v5  ;;  %v1085_v22 = vsub.f32 %v3371_v36, %v1021_v25 }
 0x2c3   :  { %v3497_v56 = vpop.eup %2894  ;;  %2914 = vpow2.f32 %v1144_v11  ;;  %v1116_v60 = vmul.f32 1.442695, %v1069_v39 }
 0x2c4   :  { %v3507_v4 = vpop.eup %2896  ;;  %2916 = vpow2.f32 %v1132_v14  ;;  %v1148_v47 = vmul.f32 1.442695, %v1085_v22 }
 0x2c5   :  { %1249 = vperm.xlu0 %2837, %v3495_v59   ;;  %v3509_v8 = vpop.eup %2898  ;;  %2918 = vpow2.f32 %v1146_v62 }
 0x2c6   :  { %1207 = vperm.xlu1 %2836, %v3497_v56   ;;  %v3517_v23 = vpop.eup %2900  ;;  %2920 = vpow2.f32 %v1112_v43 }
 0x2c7   :  { %v3519_v54 = vpop.eup %2902  ;;  %2922 = vpow2.f32 %v1114_v57 }
 0x2c8   :  { %v3526_v3 = vpop.eup %2904  ;;  %2924 = vpow2.f32 %v1116_v60 }
 0x2c9   :  { %1195 = vperm.xlu0 %2837, %v3507_v4   ;;  %v3528_v45 = vpop.eup %2906  ;;  %2926 = vpow2.f32 %v1148_v47 }
 0x2ca   :  { %1210 = vperm.xlu1 %2836, %v3509_v8   ;;  %v3535_v40 = vpop.eup %2908 }
 0x2cb   :  { %v3537_v6 = vpop.eup %2910 }
 0x2cc   :  { %v3544_v44 = vpop.eup %2912 }
 0x2cd   :  { %1201 = vperm.xlu0 %2837, %v3517_v23   ;;  %v3546_v24 = vpop.eup %2914 }
 0x2ce   :  { %1213 = vperm.xlu1 %2836, %v3519_v54   ;;  %v3551_v61 = vpop.eup %2916 }
 0x2cf   :  { %v3553_v53 = vpop.eup %2918 }
 0x2d0   :  { %v3557_v58 = vpop.eup %2920 }
 0x2d1   :  { %1204 = vperm.xlu0 %2837, %v3526_v3   ;;  %v3562_v36 = vpop.eup %2922 }
 0x2d2   :  { %1216 = vperm.xlu1 %2836, %v3528_v45   ;;  %v3567_v30 = vpop.eup %2924 }
 0x2d3   :  { %v3572_v46 = vpop.eup %2926 }
 0x2d5   :  { %1267 = vperm.xlu0 %2837, %v3535_v40  }
 0x2d6   :  { %1198 = vperm.xlu1 %2836, %v3537_v6  }
 0x2d9   :  { %1219 = vperm.xlu0 %2837, %v3544_v44  }
 0x2da   :  { %1270 = vperm.xlu1 %2836, %v3546_v24  }
 0x2dd   :  { %1252 = vperm.xlu0 %2837, %v3551_v61  }
 0x2de   :  { %1273 = vperm.xlu1 %2836, %v3553_v53  }
 0x2e1   :  { %1830 = vrot.lane.b32.xlu0 %v3070_v12, %s2991_s2 }
 0x2e2   :  { %1222 = vperm.xlu1 %2836, %v3557_v58  }
 0x2e5   :  { %1838 = vrot.lane.b32.xlu0 %v3068_v10, %s2991_s2 }
 0x2e6   :  { %1225 = vperm.xlu1 %2836, %v3562_v36  }
 0x2e9   :  { %1832 = vrot.lane.b32.xlu0 %v3096_v20, %s2991_s2 }
 0x2ea   :  { %1228 = vperm.xlu1 %2836, %v3567_v30  }
 0x2ee   :  { %1276 = vperm.xlu1 %2836, %v3572_v46  }
 0x2f2   :  { %1834 = vrot.lane.b32.xlu1 %v3082_v17, %s2991_s2 }
 0x2f6   :  { %1842 = vrot.lane.b32.xlu1 %v3074_v15, %s2991_s2 }
 0x310   :  { %v1232_v10 = vpop.permute.xlu1 %1231 }
 0x311   :  { %v1238_v12 = vpop.permute.xlu0 %1237  ;;  %v1345_v55 = vrot.slane %v1232_v10, %v3218_v27 }
 0x312   :  { %v1353_v20 = vrot.slane %v1238_v12, %v3218_v27 }
 0x314   :  { %v1235_v13 = vpop.permute.xlu1 %1234 }
 0x315   :  { %v1349_v9 = vrot.slane %v1235_v13, %v3218_v27  ;;  %v1241_v48 = vpop.permute.xlu0 %1240 }
 0x316   :  { %v1357_v11 = vrot.slane %v1241_v48, %v3218_v27 }
 0x317   :  { %v1418_v14 = vsel %vm826_vm2, %v1349_v9, %v1345_v55 }
 0x318   :  { %v1419_v34 = vsel %vm828_vm3, %v1353_v20, %v1418_v14 }
 0x319   :  { %v1420_v17 = vsel %vm830_vm4, %v1357_v11, %v1419_v34 }
 0x31a   :  { %v1450_v15 = vsel %vm861_vm5, %v1420_v17, 0.0 }
 0x31b   :  { %1451 = vadd.xlane.f32.xlu0 %v1450_v15 }
 0x31c   :  { %v1184_v35 = vpop.permute.xlu1 %1183 }
 0x31d   :  { %v1187_v62 = vpop.permute.xlu0 %1186  ;;  %v1281_v5 = vrot.slane %v1184_v35, %v3218_v27 }
 0x31e   :  { %v1285_v42 = vrot.slane %v1187_v62, %v3218_v27 }
 0x320   :  { %v1190_v43 = vpop.permute.xlu1 %1189  ;;  %v1406_v25 = vsel %vm826_vm2, %v1285_v42, %v1281_v5 }
 0x321   :  { %v1193_v39 = vpop.permute.xlu0 %1192  ;;  %v1289_v57 = vrot.slane %v1190_v43, %v3218_v27 }
 0x322   :  { %v1293_v60 = vrot.slane %v1193_v39, %v3218_v27 }
 0x323   :  { %v1407_v22 = vsel %vm828_vm3, %v1289_v57, %v1406_v25 }
 0x324   :  { %v1256_v47 = vpop.permute.xlu1 %1255  ;;  %v1408_v10 = vsel %vm830_vm4, %v1293_v60, %v1407_v22 }
 0x325   :  { %v1438_v12 = vsel %vm861_vm5, %v1408_v10, 0.0  ;;  %v1377_v48 = vrot.slane %v1256_v47, %v3218_v27 }
 0x326   :  { %1439 = vadd.xlane.f32.xlu0 %v1438_v12 }
 0x328   :  { %v1259_v13 = vpop.permute.xlu1 %1258 }
 0x329   :  { %v1381_v9 = vrot.slane %v1259_v13, %v3218_v27 }
 0x32b   :  { %v1424_v14 = vsel %vm826_vm2, %v1381_v9, %v1377_v48 }
 0x32c   :  { %v1262_v55 = vpop.permute.xlu1 %1261 }
 0x32d   :  { %v1385_v20 = vrot.slane %v1262_v55, %v3218_v27 }
 0x32f   :  { %v1425_v17 = vsel %vm828_vm3, %v1385_v20, %v1424_v14 }
 0x330   :  { %v1265_v11 = vpop.permute.xlu1 %1264 }
 0x331   :  { %v1389_v34 = vrot.slane %v1265_v11, %v3218_v27 }
 0x333   :  { %v1426_v15 = vsel %vm830_vm4, %v1389_v34, %v1425_v17 }
 0x334   :  { %v1456_v35 = vsel %vm861_vm5, %v1426_v15, 0.0 }
 0x335   :  { %1457 = vadd.xlane.f32.xlu0 %v1456_v35 }
 0x340   :  { %v1244_v62 = vpop.permute.xlu0 %1243 }
 0x341   :  { %v1247_v42 = vpop.permute.xlu1 %1246  ;;  %v1361_v13 = vrot.slane %v1244_v62, %v3218_v27 }
 0x342   :  { %v1365_v55 = vrot.slane %v1247_v42, %v3218_v27 }
 0x344   :  { %v1250_v5 = vpop.permute.xlu0 %1249  ;;  %v1421_v34 = vsel %vm826_vm2, %v1365_v55, %v1361_v13 }
 0x345   :  { %v1208_v43 = vpop.permute.xlu1 %1207  ;;  %v1369_v48 = vrot.slane %v1250_v5, %v3218_v27 }
 0x346   :  { %v1313_v35 = vrot.slane %v1208_v43, %v3218_v27 }
 0x347   :  { %v1422_v5 = vsel %vm828_vm3, %v1369_v48, %v1421_v34 }
 0x348   :  { %v1196_v39 = vpop.permute.xlu0 %1195 }
 0x349   :  { %v1211_v57 = vpop.permute.xlu1 %1210  ;;  %v1297_v26 = vrot.slane %v1196_v39, %v3218_v27 }
 0x34a   :  { %v1317_v11 = vrot.slane %v1211_v57, %v3218_v27 }
 0x34c   :  { %v1202_v25 = vpop.permute.xlu0 %1201  ;;  %v1412_v57 = vsel %vm826_vm2, %v1317_v11, %v1313_v35 }
 0x34d   :  { %v1214_v60 = vpop.permute.xlu1 %1213 }
 0x34e   :  { %v1321_v17 = vrot.slane %v1214_v60, %v3218_v27  ;;  %v1305_v60 = vrot.slane %v1202_v25, %v3218_v27 }
 0x350   :  { %v1205_v22 = vpop.permute.xlu0 %1204  ;;  %v1413_v43 = vsel %vm828_vm3, %v1321_v17, %v1412_v57 }
 0x351   :  { %v1217_v47 = vpop.permute.xlu1 %1216  ;;  %v1309_v48 = vrot.slane %v1205_v22, %v3218_v27 }
 0x352   :  { %v1325_v62 = vrot.slane %v1217_v47, %v3218_v27 }
 0x354   :  { %v1268_v10 = vpop.permute.xlu0 %1267  ;;  %v1414_v47 = vsel %vm830_vm4, %v1325_v62, %v1413_v43 }
 0x355   :  { %v1199_v12 = vpop.permute.xlu1 %1198  ;;  %v1444_v11 = vsel %vm861_vm5, %v1414_v47, 0.0  ;;  %v1393_v62 = vrot.slane %v1268_v10, %v3218_v27 }
 0x356   :  { %v1301_v14 = vrot.slane %v1199_v12, %v3218_v27 }
 0x358   :  { %v1220_v9 = vpop.permute.xlu0 %1219  ;;  %v1409_v12 = vsel %vm826_vm2, %v1301_v14, %v1297_v26 }
 0x359   :  { %v1271_v20 = vpop.permute.xlu1 %1270  ;;  %v1329_v57 = vrot.slane %v1220_v9, %v3218_v27 }
 0x35a   :  { %v1397_v17 = vrot.slane %v1271_v20, %v3218_v27 }
 0x35c   :  { %v1253_v15 = vpop.permute.xlu0 %1252 }
 0x35d   :  { %v1373_v42 = vrot.slane %v1253_v15, %v3218_v27  ;;  %v1274_v18 = vpop.permute.xlu1 %1273  ;;  %v1410_v15 = vsel %vm828_vm3, %v1305_v60, %v1409_v12  ;;  %v1427_v12 = vsel %vm826_vm2, %v1397_v17, %v1393_v62 }
 0x35e   :  { %v1411_v26 = vsel %vm830_vm4, %v1309_v48, %v1410_v15  ;;  %v1401_v35 = vrot.slane %v1274_v18, %v3218_v27 }
 0x35f   :  { %v1423_v13 = vsel %vm830_vm4, %v1373_v42, %v1422_v5  ;;  %v1441_v25 = vsel %vm861_vm5, %v1411_v26, 0.0 }
 0x360   :  { %v1453_v55 = vsel %vm861_vm5, %v1423_v13, 0.0  ;;  %v3643_v47 = vpop.permute.xlu0 %1830 }
 0x361   :  { %v1223_v39 = vpop.permute.xlu1 %1222  ;;  %1454 = vadd.xlane.f32.xlu1 %v1453_v55  ;;  %v1428_v55 = vsel %vm828_vm3, %v1401_v35, %v1427_v12 }
 0x362   :  { %v1333_v42 = vrot.slane %v1223_v39, %v3218_v27 }
 0x364   :  { %v1415_v20 = vsel %vm826_vm2, %v1333_v42, %v1329_v57  ;;  %v3645_v15 = vpop.permute.xlu0 %1838 }
 0x365   :  { %v1226_v34 = vpop.permute.xlu1 %1225  ;;  %1445 = vadd.xlane.f32.xlu1 %v1444_v11 }
 0x366   :  { %v1337_v22 = vrot.slane %v1226_v34, %v3218_v27 }
 0x368   :  { %v1416_v43 = vsel %vm828_vm3, %v1337_v22, %v1415_v20 }
 0x369   :  { %v1229_v14 = vpop.permute.xlu1 %1228  ;;  %1442 = vadd.xlane.f32.xlu1 %v1441_v25 }
 0x36a   :  { %v1341_v13 = vrot.slane %v1229_v14, %v3218_v27 }
 0x36c   :  { %v1417_v39 = vsel %vm830_vm4, %v1341_v13, %v1416_v43 }
 0x36d   :  { %v1277_v5 = vpop.permute.xlu1 %1276  ;;  %v1447_v9 = vsel %vm861_vm5, %v1417_v39, 0.0 }
 0x36e   :  { %v1405_v60 = vrot.slane %v1277_v5, %v3218_v27  ;;  %v3647_v27 = vpop.permute.xlu0 %1832 }
 0x370   :  { %v1429_v18 = vsel %vm830_vm4, %v1405_v60, %v1428_v55 }
 0x371   :  { %v1459_v10 = vsel %vm861_vm5, %v1429_v18, 0.0 }
 0x372   :  { %1460 = vadd.xlane.f32.xlu0 %v1459_v10 }
 0x376   :  { %1448 = vadd.xlane.f32.xlu0 %v1447_v9  ;;  %v3673_v9 = vpop.permute.xlu1 %1834 }
 0x3a8   :  { %v1452_v48 = vpop.xlane.xlu0 %1451 }
 0x3a9   :  { %2928 = vrcp.f32 %v1452_v48  ;;  %v3675_v48 = vpop.permute.xlu1 %1842 }
 0x3b3   :  { %v2929_v11 = vpop.eup %2928  ;;  %v1440_v34 = vpop.xlane.xlu0 %1439 }
 0x3b4   :  { %2930 = vrcp.f32 %v1440_v34  ;;  %v1549_v26 = vrot.slane %v2929_v11, %v3383_v49  ;;  %v1545_v25 = vrot.slane %v2929_v11, %v3114_v32  ;;  %v1553_v35 = vrot.slane %v2929_v11, %v3386_v51 }
 0x3b5   :  { %v1557_v42 = vrot.slane %v2929_v11, %v3389_v1 }
 0x3b6   :  { %v1655_v14 = vmul.f32 %v3415_v50, %v1549_v26  ;;  %v1654_v17 = vmul.f32 %v3407_v2, %v1545_v25  ;;  %v1656_v62 = vmul.f32 %v3410_v7, %v1553_v35 }
 0x3b7   :  { %v1657_v5 = vmul.f32 %v3418_v21, %v1557_v42 }
 0x3b8   :  { %1757 = vperm.xlu1 %2836, %v1655_v14   ;;  %1752 = vperm.xlu0 %2837, %v1654_v17  }
 0x3bc   :  { %1762 = vperm.xlu0 %2837, %v1656_v62  }
 0x3be   :  { %v2931_v22 = vpop.eup %2930 }
 0x3bf   :  { %v1481_v57 = vrot.slane %v2931_v22, %v3114_v32  ;;  %v1485_v12 = vrot.slane %v2931_v22, %v3383_v49  ;;  %v1489_v60 = vrot.slane %v2931_v22, %v3386_v51  ;;  %v1493_v55 = vrot.slane %v2931_v22, %v3389_v1 }
 0x3c0   :  { %1767 = vperm.xlu0 %2837, %v1657_v5  }
 0x3c1   :  { %v1638_v50 = vmul.f32 %v3426_v0, %v1481_v57  ;;  %v1639_v2 = vmul.f32 %v3428_v41, %v1485_v12  ;;  %v1640_v7 = vmul.f32 %v3433_v28, %v1489_v60  ;;  %v1641_v21 = vmul.f32 %v3435_v29, %v1493_v55 }
 0x3c2   :  { %v1458_v13 = vpop.xlane.xlu0 %1457 }
 0x3c3   :  { %2932 = vrcp.f32 %v1458_v13  ;;  %1672 = vperm.xlu1 %2836, %v1638_v50  }
 0x3c4   :  { %1677 = vperm.xlu0 %2837, %v1639_v2  }
 0x3c8   :  { %1682 = vperm.xlu0 %2837, %v1640_v7  }
 0x3cc   :  { %1687 = vperm.xlu0 %2837, %v1641_v21  }
 0x3cd   :  { %v2933_v20 = vpop.eup %2932 }
 0x3ce   :  { %v1581_v18 = vrot.slane %v2933_v20, %v3383_v49  ;;  %v1577_v0 = vrot.slane %v2933_v20, %v3114_v32  ;;  %v1585_v43 = vrot.slane %v2933_v20, %v3386_v51  ;;  %v1589_v39 = vrot.slane %v2933_v20, %v3389_v1 }
 0x3d0   :  { %v1663_v41 = vmul.f32 %v3442_v63, %v1581_v18  ;;  %v1662_v10 = vmul.f32 %v3439_v33, %v1577_v0  ;;  %v1664_v28 = vmul.f32 %v3445_v38, %v1585_v43  ;;  %v1665_v29 = vmul.f32 %v3451_v52, %v1589_v39 }
 0x3d2   :  { %1797 = vperm.xlu1 %2836, %v1663_v41   ;;  %1792 = vperm.xlu0 %2837, %v1662_v10  }
 0x3d6   :  { %1802 = vperm.xlu1 %2836, %v1664_v28  }
 0x3da   :  { %1807 = vperm.xlu1 %2836, %v1665_v29  }
 0x3ee   :  { %v1455_v11 = vpop.xlane.xlu1 %1454 }
 0x3ef   :  { %2934 = vrcp.f32 %v1455_v11 }
 0x3f2   :  { %v1446_v63 = vpop.xlane.xlu1 %1445 }
 0x3f3   :  { %2936 = vrcp.f32 %v1446_v63 }
 0x3f6   :  { %v1443_v33 = vpop.xlane.xlu1 %1442 }
 0x3f7   :  { %2938 = vrcp.f32 %v1443_v33 }
 0x3f9   :  { %v2935_v34 = vpop.eup %2934 }
 0x3fa   :  { %v1561_v26 = vrot.slane %v2935_v34, %v3114_v32  ;;  %v1565_v25 = vrot.slane %v2935_v34, %v3383_v49  ;;  %v1569_v35 = vrot.slane %v2935_v34, %v3386_v51  ;;  %v1573_v57 = vrot.slane %v2935_v34, %v3389_v1 }
 0x3fc   :  { %v1658_v38 = vmul.f32 %v3483_v37, %v1561_v26  ;;  %v1659_v62 = vmul.f32 %v3485_v31, %v1565_v25  ;;  %v1660_v37 = vmul.f32 %v3495_v59, %v1569_v35  ;;  %v1661_v2 = vmul.f32 %v3551_v61, %v1573_v57 }
 0x3fd   :  { %v2937_v14 = vpop.eup %2936 }
 0x3fe   :  { %1772 = vperm.xlu0 %2837, %v1658_v38   ;;  %v1513_v52 = vrot.slane %v2937_v14, %v3114_v32  ;;  %v1517_v22 = vrot.slane %v2937_v14, %v3383_v49  ;;  %v1521_v12 = vrot.slane %v2937_v14, %v3386_v51 }
 0x3ff   :  { %v1461_v17 = vpop.xlane.xlu0 %1460 }
 0x400   :  { %2940 = vrcp.f32 %v1461_v17  ;;  %v1646_v42 = vmul.f32 %v3497_v56, %v1513_v52  ;;  %v1647_v5 = vmul.f32 %v3509_v8, %v1517_v22  ;;  %v1648_v31 = vmul.f32 %v3519_v54, %v1521_v12 }
 0x401   :  { %v2939_v50 = vpop.eup %2938  ;;  %v1525_v56 = vrot.slane %v2937_v14, %v3389_v1 }
 0x402   :  { %1777 = vperm.xlu0 %2837, %v1659_v62   ;;  %1712 = vperm.xlu1 %2836, %v1646_v42   ;;  %v1497_v13 = vrot.slane %v2939_v50, %v3114_v32  ;;  %v1501_v21 = vrot.slane %v2939_v50, %v3383_v49  ;;  %v1505_v18 = vrot.slane %v2939_v50, %v3386_v51 }
 0x403   :  { %v1449_v59 = vpop.xlane.xlu0 %1448  ;;  %v1649_v8 = vmul.f32 %v3528_v45, %v1525_v56  ;;  %v1509_v41 = vrot.slane %v2939_v50, %v3389_v1 }
 0x404   :  { %v1642_v7 = vmul.f32 %v3507_v4, %v1497_v13  ;;  %2942 = vrcp.f32 %v1449_v59  ;;  %v1643_v61 = vmul.f32 %v3537_v6, %v1501_v21  ;;  %v1644_v4 = vmul.f32 %v3517_v23, %v1505_v18 }
 0x405   :  { %v1645_v6 = vmul.f32 %v3526_v3, %v1509_v41 }
 0x406   :  { %1782 = vperm.xlu0 %2837, %v1660_v37   ;;  %1717 = vperm.xlu1 %2836, %v1647_v5  }
 0x40a   :  { %v2941_v60 = vpop.eup %2940  ;;  %1787 = vperm.xlu0 %2837, %v1661_v2   ;;  %1722 = vperm.xlu1 %2836, %v1648_v31  }
 0x40b   :  { %v1593_v55 = vrot.slane %v2941_v60, %v3114_v32  ;;  %v1597_v20 = vrot.slane %v2941_v60, %v3383_v49  ;;  %v1601_v0 = vrot.slane %v2941_v60, %v3386_v51  ;;  %v1605_v10 = vrot.slane %v2941_v60, %v3389_v1 }
 0x40d   :  { %v1666_v54 = vmul.f32 %v3535_v40, %v1593_v55  ;;  %v1667_v45 = vmul.f32 %v3546_v24, %v1597_v20  ;;  %v1668_v40 = vmul.f32 %v3553_v53, %v1601_v0  ;;  %v1669_v28 = vmul.f32 %v3572_v46, %v1605_v10 }
 0x40e   :  { %1727 = vperm.xlu1 %2836, %v1649_v8   ;;  %1692 = vperm.xlu0 %2837, %v1642_v7   ;;  %v2943_v43 = vpop.eup %2942 }
 0x40f   :  { %v1529_v24 = vrot.slane %v2943_v43, %v3114_v32  ;;  %v1533_v39 = vrot.slane %v2943_v43, %v3383_v49  ;;  %v1537_v53 = vrot.slane %v2943_v43, %v3386_v51  ;;  %v1541_v46 = vrot.slane %v2943_v43, %v3389_v1  ;;  %v2841_v51 = vld [vmem:[%s4048_s3 + $0x8] sm:$0xff]  }
 0x411   :  { %v1650_v23 = vmul.f32 %v3544_v44, %v1529_v24  ;;  %v1651_v3 = vmul.f32 %v3557_v58, %v1533_v39  ;;  %v1652_v29 = vmul.f32 %v3562_v36, %v1537_v53  ;;  %v1653_v11 = vmul.f32 %v3567_v30, %v1541_v46  ;;  %v2840_v44 = vld [vmem:[%s4048_s3] sm:$0xff]  }
 0x412   :  { %1812 = vperm.xlu1 %2836, %v1666_v54   ;;  %1697 = vperm.xlu0 %2837, %v1643_v61  }
 0x413   :  { %2821 = vmatprep.subr.bf16.mxu0 %v2840_v44 }
 0x414   :  { %2822 = vmatpush3.bf16.msra.mxu0 %v2840_v44 }
 0x415   :  { %2823 = vmatprep.subr.bf16.mxu0 %v2841_v51 }
 0x416   :  { %1817 = vperm.xlu1 %2836, %v1667_v45   ;;  %1702 = vperm.xlu0 %2837, %v1644_v4  }
 0x418   :  { %2824 = vmatpush3.bf16.msra.mxu0 %v2841_v51 }
 0x41a   :  { %1822 = vperm.xlu1 %2836, %v1668_v40   ;;  %1707 = vperm.xlu0 %2837, %v1645_v6  }
 0x41e   :  { %1827 = vperm.xlu1 %2836, %v1669_v28   ;;  %1840 = vrot.lane.b32.xlu0 %v3078_v16, %s2991_s2  ;;  %v4059_v16 = vld [vmem:[#allocation5_spill] sm:$0xff] }
 0x422   :  { %1732 = vperm.xlu1 %2836, %v1650_v23  }
 0x426   :  { %1737 = vperm.xlu1 %2836, %v1651_v3  }
 0x42a   :  { %1742 = vperm.xlu1 %2836, %v1652_v29  }
 0x42e   :  { %1747 = vperm.xlu1 %2836, %v1653_v11  }
 0x432   :  { %1836 = vrot.lane.b32.xlu1 %v3092_v19, %s2991_s2 }
 0x436   :  { %1844 = vrot.lane.b32.xlu1 %v4059_v16, %s2991_s2 }
 0x437   :  { %v1753_v1 = vpop.permute.xlu0 %1752  ;;  %v1758_v36 = vpop.permute.xlu1 %1757 }
 0x438   :  { %v1870_v19 = vmul.f32 %v3645_v15, %v1753_v1  ;;  %v1871_v63 = vmul.f32 %v3645_v15, %v1758_v36 }
 0x43a   :  { %v1998_v34 = vsel %vm535_vm1, %v1870_v19, 0.0  ;;  %v2005_v26 = vsel %vm535_vm1, %v1871_v63, 0.0 }
 0x43b   :  { %v1763_v58 = vpop.permute.xlu0 %1762  ;;  %v1999_v25 = vrot.slane %v1998_v34, 4  ;;  %v2006_v14 = vrot.slane %v2005_v26, 4 }
 0x43c   :  { %v1872_v38 = vmul.f32 %v3645_v15, %v1763_v58 }
 0x43d   :  { %v2000_v62 = vadd.f32 %v1999_v25, %v1998_v34  ;;  %v2007_v42 = vadd.f32 %v2006_v14, %v2005_v26 }
 0x43e   :  { %v2012_v17 = vsel %vm535_vm1, %v1872_v38, 0.0 }
 0x43f   :  { %v1768_v30 = vpop.permute.xlu0 %1767  ;;  %v2013_v5 = vrot.slane %v2012_v17, 4  ;;  %v2001_v57 = vrot.slane %v2000_v62, 2  ;;  %v2008_v12 = vrot.slane %v2007_v42, 2 }
 0x440   :  { %v1873_v13 = vmul.f32 %v3645_v15, %v1768_v30 }
 0x441   :  { %v2014_v56 = vadd.f32 %v2013_v5, %v2012_v17  ;;  %v2002_v55 = vadd.f32 %v2001_v57, %v2000_v62  ;;  %v2009_v21 = vadd.f32 %v2008_v12, %v2007_v42 }
 0x442   :  { %v1673_v52 = vpop.permute.xlu1 %1672  ;;  %v2019_v20 = vsel %vm535_vm1, %v1873_v13, 0.0 }
 0x443   :  { %v1678_v33 = vpop.permute.xlu0 %1677  ;;  %v1854_v22 = vmul.f32 %v3643_v47, %v1673_v52  ;;  %v2015_v61 = vrot.slane %v2014_v56, 2  ;;  %v2020_v40 = vrot.slane %v2019_v20, 4  ;;  %v2003_v43 = vrot.slane %v2002_v55, 1 }
 0x444   :  { %v1855_v37 = vmul.f32 %v3643_v47, %v1678_v33  ;;  %v2010_v28 = vrot.slane %v2009_v21, 1 }
 0x445   :  { %v1886_v50 = vsel %vm535_vm1, %v1854_v22, 0.0  ;;  %v2016_v24 = vadd.f32 %v2015_v61, %v2014_v56  ;;  %v2021_v29 = vadd.f32 %v2020_v40, %v2019_v20  ;;  %v2004_v44 = vadd.f32 %v2003_v43, %v2002_v55 }
 0x446   :  { %v1893_v2 = vsel %vm535_vm1, %v1855_v37, 0.0  ;;  %v1887_v8 = vrot.slane %v1886_v50, 4  ;;  %v2011_v51 = vadd.f32 %v2010_v28, %v2009_v21 }
 0x447   :  { %v1683_v35 = vpop.permute.xlu0 %1682  ;;  %v1894_v7 = vrot.slane %v1893_v2, 4  ;;  %v2017_v1 = vrot.slane %v2016_v24, 1  ;;  %v2022_v26 = vrot.slane %v2021_v29, 2  ;;  %v2126_v52 = vpack.c.bf16 %v2004_v44, %v2004_v44 }
 0x448   :  { %v1856_v60 = vmul.f32 %v3643_v47, %v1683_v35  ;;  %v1888_v4 = vadd.f32 %v1887_v8, %v1886_v50  ;;  %v2127_v17 = vpack.c.bf16 %v2011_v51, %v2011_v51 }
 0x449   :  { %v1895_v0 = vadd.f32 %v1894_v7, %v1893_v2  ;;  %v2018_v35 = vadd.f32 %v2017_v1, %v2016_v24  ;;  %v2023_v50 = vadd.f32 %v2022_v26, %v2021_v29  ;;  %v2201_v13 = vunpack.c.l.b16 %v2126_v52 }
 0x44a   :  { %v1900_v18 = vsel %vm535_vm1, %v1856_v60, 0.0  ;;  %v1889_v3 = vrot.slane %v1888_v4, 2  ;;  %v2202_v60 = vunpack.c.l.b16 %v2127_v17 }
 0x44b   :  { %v1688_v31 = vpop.permute.xlu0 %1687  ;;  %v1901_v6 = vrot.slane %v1900_v18, 4  ;;  %v1896_v53 = vrot.slane %v1895_v0, 2 }
 0x44c   :  { %v1857_v45 = vmul.f32 %v3643_v47, %v1688_v31  ;;  %v1890_v63 = vadd.f32 %v1889_v3, %v1888_v4  ;;  %v2024_v4 = vrot.slane %v2023_v50, 1 }
 0x44d   :  { %v1902_v46 = vadd.f32 %v1901_v6, %v1900_v18  ;;  %v1897_v33 = vadd.f32 %v1896_v53, %v1895_v0 }
 0x44e   :  { %v1907_v23 = vsel %vm535_vm1, %v1857_v45, 0.0  ;;  %v1891_v5 = vrot.slane %v1890_v63, 1 }
 0x44f   :  { %v1908_v11 = vrot.slane %v1907_v23, 4  ;;  %v1903_v38 = vrot.slane %v1902_v46, 2  ;;  %v1898_v57 = vrot.slane %v1897_v33, 1 }
 0x450   :  { %v1892_v61 = vadd.f32 %v1891_v5, %v1890_v63 }
 0x451   :  { %v1798_v59 = vpop.permute.xlu1 %1797  ;;  %v1793_v54 = vpop.permute.xlu0 %1792  ;;  %v1909_v25 = vadd.f32 %v1908_v11, %v1907_v23  ;;  %v1904_v2 = vadd.f32 %v1903_v38, %v1902_v46  ;;  %v1899_v20 = vadd.f32 %v1898_v57, %v1897_v33  ;;  %v2025_v46 = vadd.f32 %v2024_v4, %v2023_v50 }
 0x452   :  { %v1878_v41 = vmul.f32 %v3675_v48, %v1793_v54  ;;  %v1879_v10 = vmul.f32 %v3675_v48, %v1798_v59  ;;  %v2128_v59 = vpack.c.bf16 %v2018_v35, %v2018_v35  ;;  %v2110_v3 = vpack.c.bf16 %v1892_v61, %v1892_v61 }
 0x453   :  { %v1910_v31 = vrot.slane %v1909_v25, 2  ;;  %v1905_v0 = vrot.slane %v1904_v2, 1  ;;  %v2111_v53 = vpack.c.bf16 %v1899_v20, %v1899_v20 }
 0x454   :  { %v2054_v47 = vsel %vm535_vm1, %v1878_v41, 0.0  ;;  %v2061_v16 = vsel %vm535_vm1, %v1879_v10, 0.0  ;;  %v2203_v40 = vunpack.c.l.b16 %v2128_v59  ;;  %v2129_v59 = vpack.c.bf16 %v2025_v46, %v2025_v46 }
 0x455   :  { %v1803_v15 = vpop.permute.xlu1 %1802  ;;  %v2055_v30 = vrot.slane %v2054_v47, 4  ;;  %v2062_v34 = vrot.slane %v2061_v16, 4  ;;  %v1911_v41 = vadd.f32 %v1910_v31, %v1909_v25  ;;  %v1906_v11 = vadd.f32 %v1905_v0, %v1904_v2 }
 0x456   :  { %v1880_v39 = vmul.f32 %v3675_v48, %v1803_v15  ;;  %v2235_v15 = vsel %vm826_vm2, %v2202_v60, %v2201_v13  ;;  %v2185_v25 = vunpack.c.l.b16 %v2110_v3 }
 0x457   :  { %v2056_v37 = vadd.f32 %v2055_v30, %v2054_v47  ;;  %v2063_v12 = vadd.f32 %v2062_v34, %v2061_v16  ;;  %v1912_v16 = vrot.slane %v1911_v41, 1  ;;  %v3769_v51 = vsel %vm828_vm3, %v2203_v40, %v2235_v15 }
 0x458   :  { %v2068_v19 = vsel %vm535_vm1, %v1880_v39, 0.0  ;;  %v2112_v35 = vpack.c.bf16 %v1906_v11, %v1906_v11 }
 0x459   :  { %v1808_v58 = vpop.permute.xlu1 %1807  ;;  %v2069_v62 = vrot.slane %v2068_v19, 4  ;;  %v2057_v55 = vrot.slane %v2056_v37, 2  ;;  %v2064_v18 = vrot.slane %v2063_v12, 2 }
 0x45a   :  { %v1881_v14 = vmul.f32 %v3675_v48, %v1808_v58 }
 0x45b   :  { %v2070_v48 = vadd.f32 %v2069_v62, %v2068_v19  ;;  %v2058_v28 = vadd.f32 %v2057_v55, %v2056_v37  ;;  %v2065_v47 = vadd.f32 %v2064_v18, %v2063_v12  ;;  %v1913_v62 = vadd.f32 %v1912_v16, %v1911_v41 }
 0x45c   :  { %v2075_v56 = vsel %vm535_vm1, %v1881_v14, 0.0  ;;  %v2186_v14 = vunpack.c.l.b16 %v2111_v53  ;;  %v3783_v53 = vunpack.c.l.b16 %v2129_v59 }
 0x45d   :  { %v2076_v45 = vrot.slane %v2075_v56, 4  ;;  %v2071_v6 = vrot.slane %v2070_v48, 2  ;;  %v2059_v33 = vrot.slane %v2058_v28, 1  ;;  %v2066_v52 = vrot.slane %v2065_v47, 1 }
 0x45e   :  { %v2113_v40 = vpack.c.bf16 %v1913_v62, %v1913_v62 }
 0x45f   :  { %v2077_v29 = vadd.f32 %v2076_v45, %v2075_v56  ;;  %v2072_v1 = vadd.f32 %v2071_v6, %v2070_v48  ;;  %v2060_v56 = vadd.f32 %v2059_v33, %v2058_v28  ;;  %v2067_v48 = vadd.f32 %v2066_v52, %v2065_v47 }
 0x461   :  { %v2078_v17 = vrot.slane %v2077_v29, 2  ;;  %v2073_v5 = vrot.slane %v2072_v1, 1  ;;  %v2134_v6 = vpack.c.bf16 %v2060_v56, %v2060_v56 }
 0x463   :  { %v2074_v18 = vadd.f32 %v2073_v5, %v2072_v1 }
 0x465   :  { %v2136_v11 = vpack.c.bf16 %v2074_v18, %v2074_v18 }
 0x47d   :  { %v3750_v36 = vpop.permute.xlu0 %1772 }
 0x481   :  { %v3754_v42 = vpop.permute.xlu0 %1777  ;;  %v1713_v22 = vpop.permute.xlu1 %1712 }
 0x482   :  { %v1862_v21 = vmul.f32 %v3673_v9, %v1713_v22 }
 0x484   :  { %v1942_v24 = vsel %vm535_vm1, %v1862_v21, 0.0  ;;  %v2217_v21 = vsel %vm826_vm2, %v2186_v14, %v2185_v25 }
 0x485   :  { %v3757_v8 = vpop.permute.xlu0 %1782  ;;  %v1718_v7 = vpop.permute.xlu1 %1717  ;;  %v1943_v58 = vrot.slane %v1942_v24, 4 }
 0x486   :  { %v1863_v54 = vmul.f32 %v3673_v9, %v1718_v7  ;;  %v2079_v7 = vadd.f32 %v2078_v17, %v2077_v29 }
 0x487   :  { %v1944_v57 = vadd.f32 %v1943_v58, %v1942_v24  ;;  %v2135_v24 = vpack.c.bf16 %v2067_v48, %v2067_v48 }
 0x488   :  { %v1949_v23 = vsel %vm535_vm1, %v1863_v54, 0.0  ;;  %v2187_v54 = vunpack.c.l.b16 %v2112_v35 }
 0x489   :  { %v3762_v10 = vpop.permute.xlu0 %1787  ;;  %v1723_v43 = vpop.permute.xlu1 %1722  ;;  %v1950_v30 = vrot.slane %v1949_v23, 4  ;;  %v1945_v45 = vrot.slane %v1944_v57, 2 }
 0x48a   :  { %v1864_v39 = vmul.f32 %v3673_v9, %v1723_v43  ;;  %v3786_v47 = vsel %vm828_vm3, %v2187_v54, %v2217_v21 }
 0x48b   :  { %v1951_v12 = vadd.f32 %v1950_v30, %v1949_v23  ;;  %v2080_v23 = vrot.slane %v2079_v7, 1  ;;  %v1946_v16 = vadd.f32 %v1945_v45, %v1944_v57 }
 0x48c   :  { %v1956_v44 = vsel %vm535_vm1, %v1864_v39, 0.0 }
 0x48d   :  { %v1693_v19 = vpop.permute.xlu0 %1692  ;;  %v1728_v63 = vpop.permute.xlu1 %1727  ;;  %v1957_v34 = vrot.slane %v1956_v44, 4  ;;  %v1952_v4 = vrot.slane %v1951_v12, 2  ;;  %v3798_v25 = vadd.f32 %v2080_v23, %v2079_v7 }
 0x48e   :  { %v1858_v26 = vmul.f32 %v3647_v27, %v1693_v19  ;;  %v1865_v38 = vmul.f32 %v3673_v9, %v1728_v63  ;;  %v3791_v19 = vunpack.c.l.b16 %v2113_v40 }
 0x48f   :  { %v1958_v13 = vadd.f32 %v1957_v34, %v1956_v44  ;;  %v1953_v44 = vadd.f32 %v1952_v4, %v1951_v12 }
 0x490   :  { %v1914_v22 = vsel %vm535_vm1, %v1858_v26, 0.0  ;;  %v1963_v37 = vsel %vm535_vm1, %v1865_v38, 0.0  ;;  %v3794_v26 = vunpack.c.l.b16 %v2134_v6  ;;  %v3796_v38 = vunpack.c.l.b16 %v2135_v24 }
 0x491   :  { %v1915_v50 = vrot.slane %v1914_v22, 4  ;;  %v1698_v2 = vpop.permute.xlu0 %1697  ;;  %v3775_v31 = vpop.permute.xlu1 %1812  ;;  %v1964_v9 = vrot.slane %v1963_v37, 4  ;;  %v1959_v43 = vrot.slane %v1958_v13, 2  ;;  %v1954_v5 = vrot.slane %v1953_v44, 1 }
 0x492   :  { %v1859_v60 = vmul.f32 %v3647_v27, %v1698_v2 }
 0x493   :  { %v1916_v55 = vadd.f32 %v1915_v50, %v1914_v22  ;;  %v1965_v61 = vadd.f32 %v1964_v9, %v1963_v37  ;;  %v1960_v63 = vadd.f32 %v1959_v43, %v1958_v13  ;;  %v3801_v22 = vunpack.c.l.b16 %v2136_v11 }
 0x494   :  { %v1921_v20 = vsel %vm535_vm1, %v1859_v60, 0.0  ;;  %v1947_v37 = vrot.slane %v1946_v16, 1  ;;  %v2137_v9 = vpack.c.bf16 %v3798_v25, %v3798_v25 }
 0x495   :  { %v1922_v0 = vrot.slane %v1921_v20, 4  ;;  %v1703_v41 = vpop.permute.xlu0 %1702  ;;  %v3780_v15 = vpop.permute.xlu1 %1817  ;;  %v1917_v39 = vrot.slane %v1916_v55, 2  ;;  %v1966_v29 = vrot.slane %v1965_v61, 2 }
 0x496   :  { %v1860_v28 = vmul.f32 %v3647_v27, %v1703_v41 }
 0x497   :  { %v1923_v3 = vadd.f32 %v1922_v0, %v1921_v20  ;;  %v1918_v14 = vadd.f32 %v1917_v39, %v1916_v55  ;;  %v1967_v52 = vadd.f32 %v1966_v29, %v1965_v61  ;;  %v1948_v61 = vadd.f32 %v1947_v37, %v1946_v16 }
 0x498   :  { %v1928_v46 = vsel %vm535_vm1, %v1860_v28, 0.0 }
 0x499   :  { %v1924_v1 = vrot.slane %v1923_v3, 2  ;;  %v1708_v58 = vpop.permute.xlu0 %1707  ;;  %v3789_v30 = vpop.permute.xlu1 %1822  ;;  %v1929_v33 = vrot.slane %v1928_v46, 4  ;;  %v1919_v60 = vrot.slane %v1918_v14, 1  ;;  %v1968_v7 = vrot.slane %v1967_v52, 1 }
 0x49a   :  { %v1861_v34 = vmul.f32 %v3647_v27, %v1708_v58  ;;  %v1961_v27 = vrot.slane %v1960_v63, 1  ;;  %v2118_v16 = vpack.c.bf16 %v1948_v61, %v1948_v61 }
 0x49b   :  { %v1925_v17 = vadd.f32 %v1924_v1, %v1923_v3  ;;  %v1930_v35 = vadd.f32 %v1929_v33, %v1928_v46  ;;  %v1920_v40 = vadd.f32 %v1919_v60, %v1918_v14  ;;  %v1969_v28 = vadd.f32 %v1968_v7, %v1967_v52 }
 0x49c   :  { %v1935_v62 = vsel %vm535_vm1, %v1861_v34, 0.0  ;;  %v1962_v4 = vadd.f32 %v1961_v27, %v1960_v63  ;;  %v2212_v27 = vunpack.c.l.b16 %v2137_v9  ;;  %v2237_v9 = vsel %vm830_vm4, %v3783_v53, %v3769_v51 }
 0x49d   :  { %v1936_v57 = vrot.slane %v1935_v62, 4  ;;  %v1841_v12 = vpop.permute.xlu0 %1840  ;;  %v3803_v50 = vpop.permute.xlu1 %1827  ;;  %v1931_v2 = vrot.slane %v1930_v35, 2  ;;  %v1926_v55 = vrot.slane %v1925_v17, 1  ;;  %v2114_v14 = vpack.c.bf16 %v1920_v40, %v1920_v40 }
 0x49e   :  { %v1874_v56 = vmul.f32 %v1841_v12, %v3750_v36  ;;  %v1875_v13 = vmul.f32 %v1841_v12, %v3754_v42  ;;  %v1876_v48 = vmul.f32 %v1841_v12, %v3757_v8  ;;  %v1877_v21 = vmul.f32 %v1841_v12, %v3762_v10 }
 0x49f   :  { %v1937_v59 = vadd.f32 %v1936_v57, %v1935_v62  ;;  %v1932_v20 = vadd.f32 %v1931_v2, %v1930_v35  ;;  %v1955_v42 = vadd.f32 %v1954_v5, %v1953_v44  ;;  %v1927_v10 = vadd.f32 %v1926_v55, %v1925_v17 }
 0x4a0   :  { %v2026_v54 = vsel %vm535_vm1, %v1874_v56, 0.0  ;;  %v2033_v0 = vsel %vm535_vm1, %v1875_v13, 0.0  ;;  %v2040_v41 = vsel %vm535_vm1, %v1876_v48, 0.0  ;;  %v2047_v23 = vsel %vm535_vm1, %v1877_v21, 0.0 }
 0x4a1   :  { %v1938_v18 = vrot.slane %v1937_v59, 2  ;;  %v2027_v45 = vrot.slane %v2026_v54, 4  ;;  %v3812_v36 = vpop.permute.xlu1 %1732  ;;  %v2034_v43 = vrot.slane %v2033_v0, 4  ;;  %v2041_v24 = vrot.slane %v2040_v41, 4 }
 0x4a2   :  { %v1933_v39 = vrot.slane %v1932_v20, 1  ;;  %v2048_v46 = vrot.slane %v2047_v23, 4  ;;  %v2119_v44 = vpack.c.bf16 %v1955_v42, %v1955_v42  ;;  %v2120_v63 = vpack.c.bf16 %v1962_v4, %v1962_v4 }
 0x4a3   :  { %v1939_v8 = vadd.f32 %v1938_v18, %v1937_v59  ;;  %v2028_v6 = vadd.f32 %v2027_v45, %v2026_v54  ;;  %v2035_v29 = vadd.f32 %v2034_v43, %v2033_v0  ;;  %v2042_v58 = vadd.f32 %v2041_v24, %v2040_v41 }
 0x4a4   :  { %v2049_v25 = vadd.f32 %v2048_v46, %v2047_v23  ;;  %v2121_v52 = vpack.c.bf16 %v1969_v28, %v1969_v28  ;;  %v2115_v17 = vpack.c.bf16 %v1927_v10, %v1927_v10  ;;  %v1934_v62 = vadd.f32 %v1933_v39, %v1932_v20 }
 0x4a5   :  { %v2029_v3 = vrot.slane %v2028_v6, 2  ;;  %v1738_v11 = vpop.permute.xlu1 %1737  ;;  %v1940_v1 = vrot.slane %v1939_v8, 1  ;;  %v2036_v34 = vrot.slane %v2035_v29, 2  ;;  %v2043_v35 = vrot.slane %v2042_v58, 2 }
 0x4a6   :  { %v2050_v57 = vrot.slane %v2049_v25, 2  ;;  %v2193_v2 = vunpack.c.l.b16 %v2118_v16  ;;  %v2194_v60 = vunpack.c.l.b16 %v2119_v44  ;;  %v2195_v55 = vunpack.c.l.b16 %v2120_v63 }
 0x4a7   :  { %v2030_v33 = vadd.f32 %v2029_v3, %v2028_v6  ;;  %v2037_v5 = vadd.f32 %v2036_v34, %v2035_v29  ;;  %v1941_v56 = vadd.f32 %v1940_v1, %v1939_v8  ;;  %v2044_v13 = vadd.f32 %v2043_v35, %v2042_v58 }
 0x4a8   :  { %v2051_v7 = vadd.f32 %v2050_v57, %v2049_v25  ;;  %v2189_v21 = vunpack.c.l.b16 %v2114_v14  ;;  %v2196_v54 = vunpack.c.l.b16 %v2121_v52  ;;  %v2190_v18 = vunpack.c.l.b16 %v2115_v17 }
 0x4a9   :  { %v2031_v37 = vrot.slane %v2030_v33, 1  ;;  %v1743_v12 = vpop.permute.xlu1 %1742  ;;  %v2038_v48 = vrot.slane %v2037_v5, 1  ;;  %v2045_v61 = vrot.slane %v2044_v13, 1  ;;  %v2116_v45 = vpack.c.bf16 %v1934_v62, %v1934_v62 }
 0x4aa   :  { %v2219_v0 = vsel %vm830_vm4, %v3791_v19, %v3786_v47  ;;  %v2242_v41 = vsel %vm826_vm2, %v3796_v38, %v3794_v26  ;;  %v2117_v40 = vpack.c.bf16 %v1941_v56, %v1941_v56  ;;  %v2228_v8 = vsel %vm826_vm2, %v2194_v60, %v2193_v2 }
 0x4ab   :  { %v2032_v59 = vadd.f32 %v2031_v37, %v2030_v33  ;;  %v2039_v42 = vadd.f32 %v2038_v48, %v2037_v5  ;;  %v3827_v6 = vadd.f32 %v2045_v61, %v2044_v13  ;;  %v2052_v43 = vrot.slane %v2051_v7, 1 }
 0x4ac   :  { %v2243_v10 = vsel %vm828_vm3, %v3801_v22, %v2242_v41  ;;  %v2229_v51 = vsel %vm828_vm3, %v2195_v55, %v2228_v8  ;;  %v2221_v53 = vsel %vm2220_vm6, %v2189_v21, %v2219_v0  ;;  %v3839_v26 = vunpack.c.l.b16 %v2116_v45 }
 0x4ad   :  { %v2130_v20 = vpack.c.bf16 %v2032_v59, %v2032_v59  ;;  %v1748_v4 = vpop.permute.xlu1 %1747  ;;  %v2131_v28 = vpack.c.bf16 %v2039_v42, %v2039_v42  ;;  %v3834_v47 = vsel %vm830_vm4, %v2212_v27, %v2243_v10  ;;  %v3837_v19 = vsel %vm830_vm4, %v2196_v54, %v2229_v51 }
 0x4ae   :  { %v3842_v23 = vsel %vm2222_vm7, %v2190_v18, %v2221_v53  ;;  %v3844_v39 = vunpack.c.l.b16 %v2117_v40  ;;  %v3847_v46 = vadd.f32 %v2052_v43, %v2051_v7  ;;  %v2132_v16 = vpack.c.bf16 %v3827_v6, %v3827_v6 }
 0x4af   :  { %v2205_v24 = vunpack.c.l.b16 %v2130_v20  ;;  %v3851_v44 = vunpack.c.l.b16 %v2131_v28 }
 0x4b1   :  { %v1837_v38 = vpop.permute.xlu1 %1836  ;;  %v3854_v58 = vsel %vm2220_vm6, %v2205_v24, %v2237_v9 }
 0x4b2   :  { %v1866_v22 = vmul.f32 %v1837_v38, %v3812_v36  ;;  %v1867_v3 = vmul.f32 %v1837_v38, %v1738_v11  ;;  %v1868_v29 = vmul.f32 %v1837_v38, %v1743_v12  ;;  %v1869_v1 = vmul.f32 %v1837_v38, %v1748_v4 }
 0x4b4   :  { %v1970_v63 = vsel %vm535_vm1, %v1866_v22, 0.0  ;;  %v1977_v33 = vsel %vm535_vm1, %v1867_v3, 0.0  ;;  %v1984_v34 = vsel %vm535_vm1, %v1868_v29, 0.0  ;;  %v1991_v14 = vsel %vm535_vm1, %v1869_v1, 0.0 }
 0x4b5   :  { %v1971_v36 = vrot.slane %v1970_v63, 4  ;;  %v1978_v11 = vrot.slane %v1977_v33, 4  ;;  %v1985_v25 = vrot.slane %v1984_v34, 4  ;;  %v1845_v52 = vpop.permute.xlu1 %1844  ;;  %v1992_v17 = vrot.slane %v1991_v14, 4 }
 0x4b6   :  { %v1882_v35 = vmul.f32 %v1845_v52, %v3775_v31  ;;  %v1883_v62 = vmul.f32 %v1845_v52, %v3780_v15  ;;  %v1884_v37 = vmul.f32 %v1845_v52, %v3789_v30  ;;  %v1885_v27 = vmul.f32 %v1845_v52, %v3803_v50 }
 0x4b7   :  { %v1972_v5 = vadd.f32 %v1971_v36, %v1970_v63  ;;  %v1979_v57 = vadd.f32 %v1978_v11, %v1977_v33  ;;  %v1986_v12 = vadd.f32 %v1985_v25, %v1984_v34  ;;  %v1993_v2 = vadd.f32 %v1992_v17, %v1991_v14 }
 0x4b8   :  { %v2082_v56 = vsel %vm535_vm1, %v1882_v35, 0.0  ;;  %v2089_v13 = vsel %vm535_vm1, %v1883_v62, 0.0  ;;  %v2096_v60 = vsel %vm535_vm1, %v1884_v37, 0.0  ;;  %v2103_v30 = vsel %vm535_vm1, %v1885_v27, 0.0 }
 0x4b9   :  { %v1973_v59 = vrot.slane %v1972_v5, 2  ;;  %v1980_v48 = vrot.slane %v1979_v57, 2  ;;  %v1987_v7 = vrot.slane %v1986_v12, 2  ;;  %v2083_v31 = vrot.slane %v2082_v56, 4 }
 0x4ba   :  { %v1994_v55 = vrot.slane %v1993_v2, 2  ;;  %v2090_v15 = vrot.slane %v2089_v13, 4  ;;  %v2097_v21 = vrot.slane %v2096_v60, 4  ;;  %v2104_v4 = vrot.slane %v2103_v30, 4 }
 0x4bb   :  { %v1974_v54 = vadd.f32 %v1973_v59, %v1972_v5  ;;  %v1981_v61 = vadd.f32 %v1980_v48, %v1979_v57  ;;  %v1988_v18 = vadd.f32 %v1987_v7, %v1986_v12  ;;  %v2084_v50 = vadd.f32 %v2083_v31, %v2082_v56 }
 0x4bc   :  { %v1995_v45 = vadd.f32 %v1994_v55, %v1993_v2  ;;  %v2091_v42 = vadd.f32 %v2090_v15, %v2089_v13  ;;  %v2098_v20 = vadd.f32 %v2097_v21, %v2096_v60  ;;  %v2105_v10 = vadd.f32 %v2104_v4, %v2103_v30 }
 0x4bd   :  { %v1975_v9 = vrot.slane %v1974_v54, 1  ;;  %v1982_v0 = vrot.slane %v1981_v61, 1  ;;  %v1989_v41 = vrot.slane %v1988_v18, 1  ;;  %v2085_v40 = vrot.slane %v2084_v50, 2 }
 0x4be   :  { %v1996_v8 = vrot.slane %v1995_v45, 1  ;;  %v2092_v43 = vrot.slane %v2091_v42, 2  ;;  %v2099_v28 = vrot.slane %v2098_v20, 2  ;;  %v2106_v1 = vrot.slane %v2105_v10, 2 }
 0x4bf   :  { %v1976_v51 = vadd.f32 %v1975_v9, %v1974_v54  ;;  %v1983_v53 = vadd.f32 %v1982_v0, %v1981_v61  ;;  %v1990_v24 = vadd.f32 %v1989_v41, %v1988_v18  ;;  %v2086_v38 = vadd.f32 %v2085_v40, %v2084_v50 }
 0x4c0   :  { %v1997_v22 = vadd.f32 %v1996_v8, %v1995_v45  ;;  %v2093_v3 = vadd.f32 %v2092_v43, %v2091_v42  ;;  %v2100_v29 = vadd.f32 %v2099_v28, %v2098_v20  ;;  %v2107_v52 = vadd.f32 %v2106_v1, %v2105_v10  ;;  %v3902_v43 = vld [vmem:[%s4045_s0] sm:$0xff]  ;;  %v3922_v1 = vld [vmem:[%s4045_s0 + $0x18] sm:$0xff] }
 0x4c1   :  { %v2122_v63 = vpack.c.bf16 %v1976_v51, %v1976_v51  ;;  %v2123_v33 = vpack.c.bf16 %v1983_v53, %v1983_v53  ;;  %v2124_v34 = vpack.c.bf16 %v1990_v24, %v1990_v24  ;;  %v2087_v36 = vrot.slane %v2086_v38, 1  ;;  %v3908_v51 = vld [vmem:[%s4045_s0 + $0x10] sm:$0xff] }
 0x4c2   :  { %v2125_v11 = vpack.c.bf16 %v1997_v22, %v1997_v22  ;;  %v2094_v25 = vrot.slane %v2093_v3, 1  ;;  %v2101_v14 = vrot.slane %v2100_v29, 1  ;;  %v2133_v17 = vpack.c.bf16 %v3847_v46, %v3847_v46 }
 0x4c3   :  { %v2197_v35 = vunpack.c.l.b16 %v2122_v63  ;;  %v2198_v62 = vunpack.c.l.b16 %v2123_v33  ;;  %v2088_v37 = vadd.f32 %v2087_v36, %v2086_v38  ;;  %v2108_v12 = vrot.slane %v2107_v52, 1  ;;  %v3914_v38 = vld [vmem:[%s4045_s0 + $0x8] sm:$0xff] }
 0x4c4   :  { %v2095_v5 = vadd.f32 %v2094_v25, %v2093_v3  ;;  %v2102_v57 = vadd.f32 %v2101_v14, %v2100_v29  ;;  %v2239_v27 = vsel %vm2222_vm7, %v3851_v44, %v3854_v58  ;;  %v2199_v2 = vunpack.c.l.b16 %v2124_v34 }
 0x4c5   :  { %v2138_v56 = vpack.c.bf16 %v2088_v37, %v2088_v37  ;;  %v2200_v13 = vunpack.c.l.b16 %v2125_v11  ;;  %v2231_v60 = vsel %vm2220_vm6, %v2197_v35, %v3837_v19  ;;  %v2109_v59 = vadd.f32 %v2108_v12, %v2107_v52 }
 0x4c6   :  { %v2139_v48 = vpack.c.bf16 %v2095_v5, %v2095_v5  ;;  %v2140_v7 = vpack.c.bf16 %v2102_v57, %v2102_v57  ;;  %v2232_v46 = vsel %vm2222_vm7, %v2198_v62, %v2231_v60  ;;  %v2207_v31 = vunpack.c.l.b16 %v2132_v16 }
 0x4c7   :  { %v2213_v55 = vunpack.c.l.b16 %v2138_v56  ;;  %v2225_v44 = vsel %vm2224_vm8, %v3839_v26, %v3842_v23  ;;  %v2233_v58 = vsel %vm2224_vm8, %v2199_v2, %v2232_v46  ;;  %v2141_v15 = vpack.c.bf16 %v2109_v59, %v2109_v59  ;;  %v2842_v46 = vld [vmem:[%s4050_s5] ss:$8 sps:$4 sm:$0xff]  }
 0x4c8   :  { %v2214_v21 = vunpack.c.l.b16 %v2139_v48  ;;  %v2227_v19 = vsel %vm2226_vm9, %v3844_v39, %v2225_v44  ;;  %v2234_v30 = vsel %vm2226_vm9, %v2200_v13, %v2233_v58  ;;  %v2215_v54 = vunpack.c.l.b16 %v2140_v7  ;;  %v2845_v44 = vld [vmem:[%s4050_s5 + $0x10] ss:$8 sps:$4 sm:$0xff]   ;;  %v2848_v58 = vld [vmem:[%s4052_s7 + $0x40] sm:$0xff]  }
 0x4c9   :  { %v2245_v61 = vsel %vm2220_vm6, %v2213_v55, %v3834_v47  ;;  %v2249_v6 = vpack.c.b16 %v2234_v30, %v2227_v19  ;;  %v2240_v16 = vsel %vm2224_vm8, %v2207_v31, %v2239_v27  ;;  %v2208_v18 = vunpack.c.l.b16 %v2133_v17  ;;  %v2749_v47 = vld [vmem:[%s4049_s4] ss:$0 sm:$0xff]  ;;  %v2844_v31 = vld [vmem:[%s4050_s5 + $0x4] ss:$8 sps:$4 sm:$0xff]   ;;  %v2847_v55 = vld [vmem:[%s4050_s5 + $0x14] ss:$8 sps:$4 sm:$0xff]   ;;  %2785 = vmatprep.subr.bf16.mxu1 %v2848_v58 }
 0x4ca   :  { %v2216_v50 = vunpack.c.l.b16 %v2141_v15  ;;  %v2246_v26 = vsel %vm2222_vm7, %v2214_v21, %v2245_v61  ;;  %v4060_v20 = vmov 0   ;;  %2419 = vmatprep.subr.bf16.mxu0 %v2844_v31  ;;  %v2849_v15 = vld [vmem:[%s4052_s7] sm:$0xff]   ;;  %v2850_v21 = vld [vmem:[%s4052_s7 + $0x48] sm:$0xff]   ;;  %v2852_v30 = vld [vmem:[%s4052_s7 + $0x50] sm:$0xff]  }
 0x4cb   :  { %2825 = vmatprep.mubr.msk.bf16.mxu0 %vm63_vm0, %v2249_v6  ;;  %v2247_v23 = vsel %vm2224_vm8, %v2215_v54, %v2246_v26  ;;  %v2241_v45 = vsel %vm2226_vm9, %v2208_v18, %v2240_v16  ;;  %2786 = vmatpush3.bf16.msra.mxu1 %v2849_v15  ;;  %v2851_v19 = vld [vmem:[%s4052_s7 + $0x8] sm:$0xff]   ;;  %v2853_v54 = vld [vmem:[%s4052_s7 + $0x10] sm:$0xff]   ;;  %v2854_v61 = vld [vmem:[%s4052_s7 + $0x58] sm:$0xff]  }
 0x4cc   :  { %v2248_v39 = vsel %vm2226_vm9, %v2216_v50, %v2247_v23  ;;  %2787 = vmatprep.subr.bf16.mxu1 %v2850_v21  ;;  %v2855_v6 = vld [vmem:[%s4052_s7 + $0x18] sm:$0xff]   ;;  %v2856_v16 = vld [vmem:[%s4052_s7 + $0x60] sm:$0xff]   ;;  %v2858_v50 = vld [vmem:[%s4052_s7 + $0x68] sm:$0xff]  }
 0x4cd   :  { %v2250_v42 = vpack.c.b16 %v2248_v39, %v2241_v45  ;;  %v2857_v18 = vld [vmem:[%s4052_s7 + $0x20] sm:$0xff]  }
 0x4cf   :  { %2826 = vmatmul.mubr.msk.bf16.vlgmr.msra.gmra.mrb[4].mxu0 %vm63_vm0, %v2250_v42  ;;  %2788 = vmatpush3.bf16.msra.mxu1 %v2851_v19 }
 0x4d0   :  { %2451 = vmatprep.mubr.bf16.mxu0 %v4060_v20  ;;  %2420 = vmatpush1.bf16.msra.mxu0 %v2842_v46 }
 0x4d1   :  { %2421 = vmatprep.subr.bf16.mxu0 %v2847_v55  ;;  %2789 = vmatprep.subr.bf16.mxu1 %v2852_v30 }
 0x4d3   :  { %2790 = vmatpush3.bf16.msra.mxu1 %v2853_v54 }
 0x4d4   :  { %2422 = vmatpush1.bf16.msra.mxu0 %v2845_v44  ;;  %2791 = vmatprep.subr.bf16.mxu1 %v2854_v61 }
 0x4d7   :  { %2792 = vmatpush3.bf16.msra.mxu1 %v2855_v6 }
 0x4d8   :  { %2793 = vmatprep.subr.bf16.mxu1 %v2856_v16 }
 0x4db   :  { %2794 = vmatpush3.bf16.msra.mxu1 %v2857_v18 }
 0x4dc   :  { %2795 = vmatprep.subr.bf16.mxu1 %v2858_v50  ;;  %v2760_v50 = vld [vmem:[%s4053_s8] ss:$0 sm:$0xff]  ;;  %s2992_s8 = smov [#allocation2]  }
 0x4dd   :  { %s2733_s26 = sshll.u32 %s2992_s8, 4  ;;  %s2734_s26 = int_to_ptr.vmem [resolvable:$true] %s2733_s26 }
 0x4de   :  { %s2964_s5 = scalar_lea.vmem %s2734_s26, 512  ;;  %p2969_p1 = scmp.lt.s32.totalorder %s2734_s26, %s2734_s26 }
 0x4df   :  { %p2965_p0 = scmp.ne.s32.totalorder %s2734_s26, %s2964_s5  ;;  %p2970_p2 = scmp.lt.s32.totalorder %s2964_s5, %s2964_s5 }
 0x4e1   :  { %p2971_p3 = por %p2970_p2, %p2969_p1 }
 0x4e3   :  { %p2972_p4 = pnand %p2971_p3, %p2965_p0 }
 0x5a2   :  { %v2827_v4 = vpop.f32.mrb[4].mxu0 }
 0x5a3   :  { %v2303_v9 = vpop.f32.mrb[5].mxu0  ;;  %v2312_v0 = vadd.f32 %v2827_v4, %v2749_v47 }
 0x5a4   :  { %v2304_v41 = vadd.f32 %v2749_v47, %v2303_v9  ;;  %v2828_v40 = vpop.f32.mrb[6].mxu0 }
 0x5a5   :  { %v2306_v8 = vpop.f32.mrb[7].mxu0  ;;  %v2320_v53 = vadd.f32 %v3908_v51, %v2312_v0  ;;  %v2315_v24 = vadd.f32 %v2828_v40, %v2749_v47 }
 0x5a6   :  { %v2318_v28 = vadd.f32 %v3902_v43, %v2304_v41  ;;  %v2307_v10 = vadd.f32 %v2749_v47, %v2306_v8 }
 0x5a7   :  { %v2321_v63 = vadd.f32 %v3922_v1, %v2315_v24  ;;  %v2328_v33 = vsel %vm63_vm0, %v2320_v53, 0.0 }
 0x5a8   :  { %v2319_v22 = vadd.f32 %v3914_v38, %v2307_v10  ;;  %v2322_v3 = vsel %vm63_vm0, %v2318_v28, 0.0 }
 0x5a9   :  { %2323 = vadd.xlane.f32.xlu0 %v2322_v3  ;;  %v2331_v34 = vsel %vm63_vm0, %v2321_v63, 0.0 }
 0x5aa   :  { %v2325_v29 = vsel %vm63_vm0, %v2319_v22, 0.0 }
 0x5ab   :  { %2326 = vadd.xlane.f32.xlu1 %v2325_v29 }
 0x5ad   :  { %2329 = vadd.xlane.f32.xlu0 %v2328_v33 }
 0x5b1   :  { %2332 = vadd.xlane.f32.xlu0 %v2331_v34 }
 0x636   :  { %v2324_v36 = vpop.xlane.xlu0 %2323 }
 0x637   :  { %v2335_v11 = vmul.f32 0.03125, %v2324_v36  ;;  %v2859_v36 = vld [vmem:[%s4052_s7 + $0x28] sm:$0xff]  }
 0x638   :  { %v2327_v25 = vpop.xlane.xlu1 %2326  ;;  %2796 = vmatpush3.bf16.msra.mxu1 %v2859_v36 }
 0x639   :  { %v3927_v14 = vsub.f32 %v2318_v28, %v2335_v11  ;;  %v2336_v52 = vmul.f32 0.03125, %v2327_v25  ;;  %v2860_v11 = vld [vmem:[%s4052_s7 + $0x70] sm:$0xff]  }
 0x63a   :  { %v2330_v17 = vpop.xlane.xlu0 %2329  ;;  %v2861_v25 = vld [vmem:[%s4052_s7 + $0x30] sm:$0xff]   ;;  %2797 = vmatprep.subr.bf16.mxu1 %v2860_v11 }
 0x63b   :  { %v3929_v35 = vsub.f32 %v2319_v22, %v2336_v52  ;;  %v2337_v62 = vmul.f32 0.03125, %v2330_v17  ;;  %v2343_v37 = vmul.f32 %v3927_v14, %v3927_v14  ;;  %v2381_v52 = vld [vmem:[%s4051_s6] sm:$0x3] }
 0x63c   :  { %2798 = vmatpush3.bf16.msra.mxu1 %v2861_v25  ;;  %v2386_v17 = vrot.slane %v2381_v52, %v3114_v32 }
 0x63d   :  { %v3933_v5 = vsub.f32 %v2320_v53, %v2337_v62  ;;  %v2347_v57 = vsel %vm63_vm0, %v2343_v37, 0.0  ;;  %v2344_v12 = vmul.f32 %v3929_v35, %v3929_v35 }
 0x63e   :  { %2348 = vadd.xlane.f32.xlu1 %v2347_v57  ;;  %v2333_v27 = vpop.xlane.xlu0 %2332 }
 0x63f   :  { %v2338_v2 = vmul.f32 0.03125, %v2333_v27  ;;  %v2350_v56 = vsel %vm63_vm0, %v2344_v12, 0.0  ;;  %v2345_v13 = vmul.f32 %v3933_v5, %v3933_v5 }
 0x640   :  { %2351 = vadd.xlane.f32.xlu0 %v2350_v56 }
 0x641   :  { %v2342_v60 = vsub.f32 %v2321_v63, %v2338_v2  ;;  %v2353_v59 = vsel %vm63_vm0, %v2345_v13, 0.0 }
 0x642   :  { %2354 = vadd.xlane.f32.xlu1 %v2353_v59 }
 0x643   :  { %v2346_v48 = vmul.f32 %v2342_v60, %v2342_v60 }
 0x645   :  { %v2356_v7 = vsel %vm63_vm0, %v2346_v48, 0.0 }
 0x646   :  { %2357 = vadd.xlane.f32.xlu0 %v2356_v7 }
 0x6cb   :  { %v2349_v26 = vpop.xlane.xlu1 %2348 }
 0x6cc   :  { %v2359_v23 = vmul.f32 0.03125, %v2349_v26 }
 0x6cd   :  { %v2352_v45 = vpop.xlane.xlu0 %2351 }
 0x6ce   :  { %v2363_v39 = vadd.f32 1e-08, %v2359_v23  ;;  %v2360_v42 = vmul.f32 0.03125, %v2352_v45 }
 0x6cf   :  { %v2355_v47 = vpop.xlane.xlu1 %2354 }
 0x6d0   :  { %2944 = vrsqrt.f32 %v2363_v39  ;;  %v2364_v4 = vadd.f32 1e-08, %v2360_v42  ;;  %v2361_v9 = vmul.f32 0.03125, %v2355_v47 }
 0x6d2   :  { %2946 = vrsqrt.f32 %v2364_v4  ;;  %v2365_v0 = vadd.f32 1e-08, %v2361_v9 }
 0x6d3   :  { %v2358_v41 = vpop.xlane.xlu0 %2357 }
 0x6d4   :  { %v2362_v40 = vmul.f32 0.03125, %v2358_v41  ;;  %2948 = vrsqrt.f32 %v2365_v0 }
 0x6d6   :  { %v2366_v8 = vadd.f32 1e-08, %v2362_v40 }
 0x6d8   :  { %2950 = vrsqrt.f32 %v2366_v8 }
 0x6da   :  { %v2945_v28 = vpop.eup %2944 }
 0x6db   :  { %v2371_v53 = vmul.f32 %v2945_v28, %v3927_v14  ;;  %v2863_v14 = vld [vmem:[%s4052_s7 + $0x38] sm:$0xff]  }
 0x6dc   :  { %v2947_v10 = vpop.eup %2946 }
 0x6dd   :  { %v2372_v24 = vmul.f32 %v2947_v10, %v3929_v35  ;;  %v2390_v35 = vrot.slane %v2381_v52, %v3383_v49 }
 0x6de   :  { %v2949_v3 = vpop.eup %2948 }
 0x6df   :  { %v2375_v22 = vpack.c.bf16 %v2372_v24, %v2371_v53  ;;  %v2373_v33 = vmul.f32 %v2949_v3, %v3933_v5 }
 0x6e1   :  { %2758 = vmatmul.mubr.msk.bf16.vlgmr.msra.gmra.mrb[8].mxu0 %vm63_vm0, %v2375_v22 }
 0x6e2   :  { %v2951_v29 = vpop.eup %2950  ;;  %2461 = vmatprep.mubr.bf16.mxu0 %v4060_v20  ;;  %v2862_v20 = vld [vmem:[%s4052_s7 + $0x78] sm:$0xff]  }
 0x6e3   :  { %v2374_v63 = vmul.f32 %v2951_v29, %v2342_v60  ;;  %2799 = vmatprep.subr.bf16.mxu1 %v2862_v20 }
 0x6e4   :  { %2800 = vmatpush3.bf16.msra.mxu1 %v2863_v14 }
 0x6e5   :  { %v2376_v34 = vpack.c.bf16 %v2374_v63, %v2373_v33 }
 0x6e9   :  { %2759 = vmatmul.mubr.msk.bf16.gmra.mrb[12].mxu0 %vm63_vm0, %v2376_v34 }
 0x7b4   :  { %v2453_v62 = vpop.f32.mrb[8].mxu0 }
 0x7b5   :  { %v2454_v37 = vadd.f32 %v2453_v62, %v2386_v17  ;;  %v2455_v5 = vpop.f32.mrb[9].mxu0 }
 0x7b6   :  { %v2456_v57 = vadd.f32 %v2455_v5, %v2390_v35  ;;  %v2457_v12 = vpop.f32.mrb[10].mxu0 }
 0x7b7   :  { %v2458_v27 = vadd.f32 %v2457_v12, %v2386_v17  ;;  %v2459_v2 = vpop.f32.mrb[11].mxu0  ;;  %v2472_v13 = vmax.f32 %v2454_v37, 0.0 }
 0x7b8   :  { %v2460_v56 = vadd.f32 %v2459_v2, %v2390_v35  ;;  %v2473_v59 = vmax.f32 %v2456_v57, 0.0 }
 0x7b9   :  { %v2474_v60 = vmax.f32 %v2458_v27, 0.0 }
 0x7ba   :  { %v2475_v48 = vmax.f32 %v2460_v56, 0.0 }
 0x7bb   :  { %v2480_v7 = vpack.c.bf16 %v2474_v60, %v2472_v13 }
 0x7bc   :  { %v2463_v46 = vpop.f32.mrb[12].mxu0  ;;  %v2481_v31 = vpack.c.bf16 %v2475_v48, %v2473_v59 }
 0x7bd   :  { %v2464_v55 = vadd.f32 %v2463_v46, %v2386_v17  ;;  %v2465_v44 = vpop.f32.mrb[13].mxu0 }
 0x7be   :  { %v2466_v32 = vadd.f32 %v2465_v44, %v2390_v35  ;;  %v2467_v58 = vpop.f32.mrb[14].mxu0  ;;  %2651 = vmatprep.mubr.bf16.mxu1 %v2481_v31 }
 0x7bf   :  { %v2468_v49 = vadd.f32 %v2467_v58, %v2386_v17  ;;  %v2469_v15 = vpop.f32.mrb[15].mxu0  ;;  %2652 = vmatmul.mubr.bf16.vlgmr.msra.gmra.mrb[0].mxu1 %v2480_v7  ;;  %v2476_v19 = vmax.f32 %v2464_v55, 0.0 }
 0x7c0   :  { %v2470_v21 = vadd.f32 %v2469_v15, %v2390_v35  ;;  %v2477_v54 = vmax.f32 %v2466_v32, 0.0 }
 0x7c1   :  { %v2478_v30 = vmax.f32 %v2468_v49, 0.0 }
 0x7c2   :  { %v2479_v61 = vmax.f32 %v2470_v21, 0.0 }
 0x7c3   :  { %v2482_v6 = vpack.c.bf16 %v2478_v30, %v2476_v19 }
 0x7c4   :  { %v2483_v16 = vpack.c.bf16 %v2479_v61, %v2477_v54 }
 0x7c6   :  { %2659 = vmatprep.mubr.bf16.mxu1 %v2483_v16 }
 0x7c7   :  { %2660 = vmatmul.mubr.bf16.gmra.mrb[4].mxu1 %v2482_v6 }
 0x892   :  { %v2801_v18 = vpop.f32.mrb[0].mxu1 }
 0x893   :  { %v2802_v26 = vpop.f32.mrb[1].mxu1 }
 0x894   :  { %v2803_v23 = vadd.f32 %v2802_v26, %v2801_v18  ;;  %v2804_v45 = vpop.f32.mrb[2].mxu1 }
 0x895   :  { %v2805_v39 = vpop.f32.mrb[3].mxu1 }
 0x896   :  { %v2654_v42 = vadd.f32 %v2803_v23, %v2760_v50  ;;  %v2806_v47 = vadd.f32 %v2805_v39, %v2804_v45 }
 0x898   :  { %v2657_v4 = vadd.f32 %v2806_v47, %v2760_v50  ;;  %v2668_v9 = vadd.f32 %v3902_v43, %v2654_v42 }
 0x89a   :  { %v2807_v0 = vpop.f32.mrb[4].mxu1  ;;  %v2672_v41 = vsel %vm63_vm0, %v2668_v9, 0.0  ;;  %v2669_v40 = vadd.f32 %v3914_v38, %v2657_v4 }
 0x89b   :  { %2673 = vadd.xlane.f32.xlu1 %v2672_v41  ;;  %v2808_v8 = vpop.f32.mrb[5].mxu1 }
 0x89c   :  { %v2809_v28 = vadd.f32 %v2808_v8, %v2807_v0  ;;  %v2810_v10 = vpop.f32.mrb[6].mxu1  ;;  %v2675_v53 = vsel %vm63_vm0, %v2669_v40, 0.0 }
 0x89d   :  { %2676 = vadd.xlane.f32.xlu0 %v2675_v53  ;;  %v2811_v24 = vpop.f32.mrb[7].mxu1 }
 0x89e   :  { %v2662_v22 = vadd.f32 %v2809_v28, %v2760_v50  ;;  %v2812_v3 = vadd.f32 %v2811_v24, %v2810_v10 }
 0x8a0   :  { %v2665_v29 = vadd.f32 %v2812_v3, %v2760_v50  ;;  %v2670_v63 = vadd.f32 %v3908_v51, %v2662_v22 }
 0x8a2   :  { %v2678_v43 = vsel %vm63_vm0, %v2670_v63, 0.0  ;;  %v2671_v33 = vadd.f32 %v3922_v1, %v2665_v29 }
 0x8a3   :  { %2679 = vadd.xlane.f32.xlu1 %v2678_v43 }
 0x8a4   :  { %v2681_v38 = vsel %vm63_vm0, %v2671_v33, 0.0 }
 0x8a5   :  { %2682 = vadd.xlane.f32.xlu0 %v2681_v38 }
 0x928   :  { %v2674_v34 = vpop.xlane.xlu1 %2673 }
 0x929   :  { %v2684_v36 = vmul.f32 0.03125, %v2674_v34 }
 0x92a   :  { %v2677_v11 = vpop.xlane.xlu0 %2676 }
 0x92b   :  { %v2688_v25 = vsub.f32 %v2668_v9, %v2684_v36  ;;  %v2685_v20 = vmul.f32 0.03125, %v2677_v11 }
 0x92d   :  { %v2689_v14 = vsub.f32 %v2669_v40, %v2685_v20  ;;  %v2692_v52 = vmul.f32 %v2688_v25, %v2688_v25 }
 0x92f   :  { %v2696_v17 = vsel %vm63_vm0, %v2692_v52, 0.0  ;;  %v2693_v35 = vmul.f32 %v2689_v14, %v2689_v14 }
 0x930   :  { %2697 = vadd.xlane.f32.xlu1 %v2696_v17  ;;  %v2680_v51 = vpop.xlane.xlu1 %2679 }
 0x931   :  { %v2686_v62 = vmul.f32 0.03125, %v2680_v51  ;;  %v2699_v37 = vsel %vm63_vm0, %v2693_v35, 0.0 }
 0x932   :  { %2700 = vadd.xlane.f32.xlu0 %v2699_v37  ;;  %v2683_v1 = vpop.xlane.xlu0 %2682 }
 0x933   :  { %v2690_v5 = vsub.f32 %v2670_v63, %v2686_v62  ;;  %v2687_v57 = vmul.f32 0.03125, %v2683_v1 }
 0x935   :  { %v2691_v12 = vsub.f32 %v2671_v33, %v2687_v57  ;;  %v2694_v27 = vmul.f32 %v2690_v5, %v2690_v5 }
 0x937   :  { %v2702_v2 = vsel %vm63_vm0, %v2694_v27, 0.0  ;;  %v2695_v56 = vmul.f32 %v2691_v12, %v2691_v12 }
 0x938   :  { %2703 = vadd.xlane.f32.xlu1 %v2702_v2 }
 0x939   :  { %v2705_v13 = vsel %vm63_vm0, %v2695_v56, 0.0 }
 0x93a   :  { %2706 = vadd.xlane.f32.xlu0 %v2705_v13 }
 0x9bd   :  { %v2698_v60 = vpop.xlane.xlu1 %2697 }
 0x9be   :  { %v2708_v59 = vmul.f32 0.03125, %v2698_v60 }
 0x9bf   :  { %v2701_v48 = vpop.xlane.xlu0 %2700 }
 0x9c0   :  { %v2712_v7 = vadd.f32 1e-08, %v2708_v59  ;;  %v2709_v46 = vmul.f32 0.03125, %v2701_v48 }
 0x9c2   :  { %2952 = vrsqrt.f32 %v2712_v7  ;;  %v2713_v31 = vadd.f32 1e-08, %v2709_v46 }
 0x9c4   :  { %2954 = vrsqrt.f32 %v2713_v31 }
 0x9c5   :  { %v2704_v55 = vpop.xlane.xlu1 %2703 }
 0x9c6   :  { %v2710_v44 = vmul.f32 0.03125, %v2704_v55 }
 0x9c7   :  { %v2707_v32 = vpop.xlane.xlu0 %2706 }
 0x9c8   :  { %v2714_v58 = vadd.f32 1e-08, %v2710_v44  ;;  %v2711_v49 = vmul.f32 0.03125, %v2707_v32 }
 0x9ca   :  { %2956 = vrsqrt.f32 %v2714_v58  ;;  %v2715_v15 = vadd.f32 1e-08, %v2711_v49 }
 0x9cc   :  { %v2953_v21 = vpop.eup %2952  ;;  %2958 = vrsqrt.f32 %v2715_v15 }
 0x9cd   :  { %v2720_v19 = vmul.f32 %v2953_v21, %v2688_v25 }
 0x9ce   :  { %v2955_v30 = vpop.eup %2954 }
 0x9cf   :  { %2724 = vst.msk [vmem:[#allocation2] sm:$0xff] %vm63_vm0, %v2720_v19  ;;  %v2721_v54 = vmul.f32 %v2955_v30, %v2689_v14 }
 0x9d1   :  { %2725 = vst.msk [vmem:[#allocation2 + $0x8] sm:$0xff] %vm63_vm0, %v2721_v54 }
 0x9d4   :  { %v2957_v61 = vpop.eup %2956 }
 0x9d5   :  { %v2722_v6 = vmul.f32 %v2957_v61, %v2690_v5 }
 0x9d6   :  { %v2959_v16 = vpop.eup %2958 }
 0x9d7   :  { %2726 = vst.msk [vmem:[#allocation2 + $0x10] sm:$0xff] %vm63_vm0, %v2722_v6  ;;  %v2723_v18 = vmul.f32 %v2959_v16, %v2691_v12 }
 0x9d9   :  { %2727 = vst.msk [vmem:[#allocation2 + $0x18] sm:$0xff] %vm63_vm0, %v2723_v18 }
 0x9da   :  { %2975 = shalt.err (!%p2972_p4)
}
 0x9db   :  { %s2976_s28 = scalar_lea.hbm %s4054_s9, 512 }
 0x9dc   :  { %p2977_p5 = scmp.ne.s32.totalorder %s4054_s9, %s2976_s28  ;;  %p2980_p6 = scmp.lt.u32.totalorder %s2976_s28, %s4054_s9 }
 0x9de   :  { %p2982_p7 = pnand %p2980_p6, %p2977_p5 }
 0x9e0   :  { %2985 = shalt.err (!%p2982_p7)
}
 0x9e1   :  { %s2993_s11 = smov 128   ;;  %s2994_s12 = smov 8  }
 0x9e2   :  { %2739 = dma.vmem_to_hbm [thread:$0]  %s2734_s26, 512, %s4054_s9, [#allocation3], %s2993_s11, %s2993_s11, %s2994_s12  }
 0x9e3   :  { %2986 = dma.done.wait [#allocation3], 512  }
 0x9e4   :  { %2987 = vsyncadd [#allocation3], 4294966784 }
 0x9e5   :  { %2743 = vsyncpa [#allocation3], 1 }

</bundles_post_ra>
